<compile_context>
chip_gen: v5e
topology: v5e:2x2
jax: 0.10.0
libtpu: 0.0.40
codegen_flags: <defaults>
</compile_context>

<pallas_src>
import functools

import jax
import jax.numpy as jnp
from jax import lax
from jax.experimental import pallas as pl
from jax.experimental.pallas import tpu as pltpu

NEG_INF = -10000.0
_STATIC_UNROLL_S = 8      # statically unroll the recursion up to this length


# ----------------------------------------------------------------------------
# Pallas kernel: per-batch-block CRF negative log-likelihood
#   nll[b] = log Z(emissions[b]) - score(emissions[b], tags[b])
# ----------------------------------------------------------------------------
def _crf_nll_kernel(em_ref, tags_ref, prev_ref, mask_ref, trans_ref, stop_ref,
                    nll_ref, *, start_ix: int):
    S, T, TB = em_ref.shape

    # ---- hoisted loop invariants (broadcast once, reused every step) ----
    trans_mat = trans_ref[...]                                  # (T, T, 1)
    trans_b = jnp.broadcast_to(trans_mat, (T, T, TB))           # (T, T, TB)
    stop_col = stop_ref[...]                                    # (T, 1)
    iota_t = lax.broadcasted_iota(jnp.int32, (T, TB), 0)        # tag idx (sublanes)

    # ================= forward (log-partition) recursion — serial ============
    fv0 = jnp.where(iota_t == start_ix, 0.0, NEG_INF).astype(jnp.float32)

    def fwd_step(i, fv):
        emit = em_ref[i]                                        # (T, TB)
        live = mask_ref[i] != 0.0                               # (1, TB) bool
        # ntv[p, n, b] = fv[p, b] + trans[p, n] + emit[n, b]; logsumexp over p
        # (leading-dim reduce -> pure VPU, no cross-lane traffic).
        ntv = fv[:, None, :] + trans_b + emit[None, :, :]       # (T, T, TB)
        mx = jnp.max(ntv, axis=0)                               # (T, TB)
        se = jnp.sum(jnp.exp(ntv - mx[None, :, :]), axis=0)     # (T, TB), >= 1
        fv_t = mx + jnp.log(se)
        return jnp.where(live, fv_t, fv)

    if S <= _STATIC_UNROLL_S:
        fv = fv0
        for i in range(S):                 # short fixed trip count: static unroll
            fv = fwd_step(i, fv)
    else:
        fv = lax.fori_loop(0, S, fwd_step, fv0, unroll=4)

    terminal = fv + stop_col                                    # (T, TB)
    mx = jnp.max(terminal, axis=0, keepdims=True)               # (1, TB)
    alpha = mx + jnp.log(jnp.sum(jnp.exp(terminal - mx), axis=0, keepdims=True))

    # ================= gold score — vectorized over S (no fv dependence) =====
    tags_all = tags_ref[...]                                    # (S, 1, TB) int32
    prev_all = prev_ref[...]                                    # (S, 1, TB) int32
    mask_all = mask_ref[...]                                    # (S, 1, TB) f32
    live_all = mask_all != 0.0

    iota_st = lax.broadcasted_iota(jnp.int32, (S, T, TB), 1)    # tag idx per step

    # row_sel[s, p, b] = transitions[tags[s,b], p]  (row select over next tag)
    row_sel = jnp.where(tags_all == 0, trans_mat[0][None, :, :], 0.0)
    for n in range(1, T):
        row_sel = jnp.where(tags_all == n, trans_mat[n][None, :, :], row_sel)
    # trans_sc[s, b] = transitions[next, cur]  (matches module's _score_sequence)
    trans_sc = jnp.sum(jnp.where(iota_st == prev_all, row_sel, 0.0),
                       axis=1, keepdims=True)                   # (S, 1, TB)

    # emit_sc[s, b] = emissions[s, tags[s,b], b]
    emit_sc = jnp.sum(jnp.where(iota_st == tags_all, em_ref[...], 0.0),
                      axis=1, keepdims=True)                    # (S, 1, TB)

    score = jnp.sum(jnp.where(live_all, trans_sc + emit_sc, 0.0),
                    axis=0)                                     # (1, TB)

    # final transition STOP <- last real tag
    seq_len = jnp.sum(mask_all, axis=0).astype(jnp.int32)       # (1, TB)
    iota_s = lax.broadcasted_iota(jnp.int32, (S, 1, TB), 0)
    # NOTE: rows with seq_len == 0 select no position -> last_tag = 0; the
    # PyTorch reference would index tags[-1] in that degenerate case.
    last_tag = jnp.sum(jnp.where(iota_s == seq_len - 1, tags_all, 0), axis=0)
    final_sc = jnp.sum(jnp.where(iota_t == last_tag, stop_col, 0.0),
                       axis=0, keepdims=True)                   # (1, TB)

    nll_ref[...] = alpha - (score + final_sc)                   # lane-dense (1, TB)


def crf_nll_loss(emissions, tags, mask, transitions, start_ix, stop_ix):
    """CRF forward pass: mean(log Z - gold_score) over the batch."""
    B, S, T = emissions.shape
    emissions = emissions.astype(jnp.float32)
    mask = mask.astype(jnp.float32)
    tags = tags.astype(jnp.int32)
    transitions = transitions.astype(jnp.float32)

    # ---- pad batch to a multiple of 128 lanes (pad rows masked out) ----
    B_pad = ((B + 127) // 128) * 128
    if B_pad != B:
        pad = B_pad - B
        emissions = jnp.pad(emissions, ((0, pad), (0, 0), (0, 0)))
        tags = jnp.pad(tags, ((0, pad), (0, 0)))
        mask = jnp.pad(mask, ((0, pad), (0, 0)))

    # Layout plumbing (plain XLA, outside the kernel): batch -> lanes.
    em_t = jnp.transpose(emissions, (1, 2, 0))                  # (S, T, B_pad)
    tags_t = jnp.transpose(tags, (1, 0))[:, None, :]            # (S, 1, B_pad)
    prev = jnp.concatenate(
        [jnp.full((B_pad, 1), start_ix, jnp.int32), tags[:, :-1]], axis=1)
    prev_t = jnp.transpose(prev, (1, 0))[:, None, :]            # (S, 1, B_pad)
    mask_t = jnp.transpose(mask, (1, 0))[:, None, :]            # (S, 1, B_pad)
    trans3 = transitions[:, :, None]                            # (T, T, 1)
    stop_col = transitions[stop_ix, :][:, None]                 # (T, 1)

    # ---- generation-aware batch-tile sizing ----
    try:
        vmem_cap = int(pltpu.get_tpu_info().vmem_capacity_bytes)
    except Exception:
        vmem_cap = 64 << 20
    small_vmem = vmem_cap <= (64 << 20)                         # e.g. v7x
    blk_cap = (4 << 20) if small_vmem else (12 << 20)

    def blk_bytes(tb):
        # emissions block + score-path intermediates (rough working set)
        return S * tb * 4 * (3 * T + 4)

    TB = 128
    while (B_pad % (2 * TB) == 0
           and B_pad // (2 * TB) >= 2        # keep >= 2 blocks for megacore
           and blk_bytes(2 * TB) <= blk_cap):
        TB *= 2
    nb = B_pad // TB

    em_blk = S * T * TB * 4
    sm_blk = S * TB * 4
    vmem_limit = 2 * (em_blk + 3 * sm_blk) + 3 * em_blk + (4 << 20)
    vmem_cap_limit = (48 << 20) if small_vmem else (96 << 20)
    vmem_limit = int(min(max(vmem_limit, 16 << 20), vmem_cap_limit))

    cost = pl.CostEstimate(
        flops=int(B_pad * S * T * (9 * T + 8)),
        transcendentals=int(B_pad * (S * T * (T + 1) + T + 1)),
        bytes_accessed=int(4 * (em_t.size + tags_t.size + prev_t.size
                                + mask_t.size + trans3.size + stop_col.size
                                + B_pad)),
    )

    kernel = functools.partial(_crf_nll_kernel, start_ix=start_ix)
    nll = pl.pallas_call(
        kernel,
        out_shape=jax.ShapeDtypeStruct((1, B_pad), jnp.float32),
        grid=(nb,),
        in_specs=[
            pl.BlockSpec((S, T, TB), lambda b: (0, 0, b)),   # emissions
            pl.BlockSpec((S, 1, TB), lambda b: (0, 0, b)),   # tags (int32)
            pl.BlockSpec((S, 1, TB), lambda b: (0, 0, b)),   # prev tags (int32)
            pl.BlockSpec((S, 1, TB), lambda b: (0, 0, b)),   # mask (float32)
            pl.BlockSpec((T, T, 1), lambda b: (0, 0, 0)),    # transitions[prev, next]
            pl.BlockSpec((T, 1), lambda b: (0, 0)),          # transitions[stop_ix, :]
        ],
        out_specs=pl.BlockSpec((1, TB), lambda b: (0, b)),
        compiler_params=pltpu.CompilerParams(
            dimension_semantics=("parallel",),
            vmem_limit_bytes=vmem_limit),
        cost_estimate=cost,
    )(em_t, tags_t, prev_t, mask_t, trans3, stop_col)
    # TODO(synk): optional bf16 emissions input (cast to f32 in-kernel) would
    # halve HBM traffic on v5e; kept f32 here for exact parity with the module.
    return jnp.mean(nll[0, :B])


# ----------------------------------------------------------------------------
# Pure-JAX reference (direct port of the PyTorch module) for verification
# ----------------------------------------------------------------------------
def crf_nll_ref(emissions, tags, mask, transitions, start_ix, stop_ix):
    B, S, T = emissions.shape

    def lse(x, axis):
        m = jnp.max(x, axis=axis, keepdims=True)
        s = jnp.sum(jnp.exp(x - m), axis=axis, keepdims=True)
        return jnp.squeeze(m + jnp.log(jnp.maximum(s, 1e-10)), axis=axis)

    fv = jnp.full((B, T), NEG_INF, jnp.float32).at[:, start_ix].set(0.0)
    for i in range(S):
        emit = emissions[:, i, :][:, None, :]
        ntv = fv[:, :, None] + transitions[None, :, :] + emit
        fv_t = lse(ntv, axis=1)
        m_i = mask[:, i][:, None]
        fv = fv_t * m_i + fv * (1.0 - m_i)
    alpha = lse(fv + transitions[stop_ix][None, :], axis=1)

    tws = jnp.concatenate(
        [jnp.full((B, 1), start_ix, dtype=tags.dtype), tags], axis=1)
    score = jnp.zeros((B,), jnp.float32)
    for i in range(S):
        cur = tws[:, i]
        nxt = tws[:, i + 1]
        tsc = transitions[nxt, cur]
        esc = jnp.take_along_axis(emissions[:, i, :], nxt[:, None], axis=1)[:, 0]
        score = score + (tsc + esc) * mask[:, i]
    seq_len = jnp.sum(mask, axis=1).astype(jnp.int32)
    last = jnp.take_along_axis(tags, (seq_len - 1)[:, None], axis=1)[:, 0]
    score = score + transitions[stop_ix, last]
    return jnp.mean(alpha - score)


# ----------------------------------------------------------------------------
if __name__ == "__main__":
    # shapes consistent with CRF.forward: emissions (B, S, T), tags/mask (B, S)
    B, S = 4, 8
    NUM_TAGS = 7          # 5 real tags + START + STOP
    START_IX, STOP_IX = 5, 6

    key = jax.random.PRNGKey(0)
    k_em, k_tag, k_tr = jax.random.split(key, 3)

    emissions = jax.random.normal(k_em, (B, S, NUM_TAGS), dtype=jnp.float32)
    tags = jax.random.randint(k_tag, (B, S), 0, 5, dtype=jnp.int32)

    lengths = jnp.array([8, 6, 5, 8], dtype=jnp.int32)
    mask = (jnp.arange(S)[None, :] < lengths[:, None]).astype(jnp.float32)

    # deterministic parameter init (matches nn.init.uniform_(-0.1, 0.1) + constraints)
    transitions = jax.random.uniform(
        k_tr, (NUM_TAGS, NUM_TAGS), minval=-0.1, maxval=0.1, dtype=jnp.float32)
    transitions = transitions.at[:, START_IX].set(NEG_INF)
    transitions = transitions.at[STOP_IX, :].set(NEG_INF)

    loss = crf_nll_loss(emissions, tags, mask, transitions, START_IX, STOP_IX)
    loss = jax.block_until_ready(loss)

    loss_ref = crf_nll_ref(emissions, tags, mask, transitions, START_IX, STOP_IX)
    assert jnp.allclose(loss, loss_ref, rtol=1e-4, atol=1e-3), (loss, loss_ref)

    print("KERNEL_OK")
</pallas_src>

<mosaic_0001>
module attributes {stable_mosaic.version = 11 : i64} {
  func.func @_crf_nll_kernel(%arg0: i32, %arg1: memref<8x7x128xf32, #tpu.memory_space<vmem>>, %arg2: memref<8x1x128xi32, #tpu.memory_space<vmem>>, %arg3: memref<8x1x128xi32, #tpu.memory_space<vmem>>, %arg4: memref<8x1x128xf32, #tpu.memory_space<vmem>>, %arg5: memref<7x7x1xf32, #tpu.memory_space<vmem>>, %arg6: memref<7x1xf32, #tpu.memory_space<vmem>>, %arg7: memref<1x128xf32, #tpu.memory_space<vmem>>) attributes {dimension_semantics = [#tpu.dimension_semantics<parallel>], iteration_bounds = array<i64: 1>, scalar_prefetch = 0 : i64, scratch_operands = 0 : i64, tpu.core_type = #tpu.core_type<tc>, window_params = [{transform_indices = @transform_0, window_bounds = array<i64: 8, 7, 128>}, {transform_indices = @transform_1, window_bounds = array<i64: 8, 1, 128>}, {transform_indices = @transform_2, window_bounds = array<i64: 8, 1, 128>}, {transform_indices = @transform_3, window_bounds = array<i64: 8, 1, 128>}, {pipeline_mode = #tpu.pipeline_mode<synchronous>, transform_indices = @transform_4, window_bounds = array<i64: 7, 7, 1>}, {pipeline_mode = #tpu.pipeline_mode<synchronous>, transform_indices = @transform_5, window_bounds = array<i64: 7, 1>}, {transform_indices = @transform_6, window_bounds = array<i64: 1, 128>}]} {
    %c0 = arith.constant 0 : index
    %c0_0 = arith.constant 0 : index
    %c0_1 = arith.constant 0 : index
    %0 = vector.load %arg5[%c0, %c0_0, %c0_1] : memref<7x7x1xf32, #tpu.memory_space<vmem>>, vector<7x7x1xf32>
    %1 = vector.shape_cast %0 : vector<7x7x1xf32> to vector<7x7x1xf32>
    %2 = vector.broadcast %1 : vector<7x7x1xf32> to vector<7x7x128xf32>
    %c0_2 = arith.constant 0 : index
    %c0_3 = arith.constant 0 : index
    %3 = vector.load %arg6[%c0_2, %c0_3] : memref<7x1xf32, #tpu.memory_space<vmem>>, vector<7x1xf32>
    %4 = tpu.iota {dimensions = array<i32: 0>} : vector<7x128xi32>
    %c5_i32 = arith.constant 5 : i32
    %5 = vector.broadcast %c5_i32 : i32 to vector<7x128xi32>
    %6 = arith.cmpi eq, %4, %5 : vector<7x128xi32>
    %cst = arith.constant 0.000000e+00 : f32
    %cst_4 = arith.constant -1.000000e+04 : f32
    %7 = vector.broadcast %cst : f32 to vector<7x128xf32>
    %8 = vector.broadcast %cst_4 : f32 to vector<7x128xf32>
    %9 = arith.select %6, %7, %8 : vector<7x128xi1>, vector<7x128xf32>
    %c0_5 = arith.constant 0 : index
    %c0_6 = arith.constant 0 : index
    %c0_7 = arith.constant 0 : index
    %10 = vector.load %arg1[%c0_5, %c0_6, %c0_7] : memref<8x7x128xf32, #tpu.memory_space<vmem>>, vector<1x7x128xf32>
    %11 = vector.shape_cast %10 : vector<1x7x128xf32> to vector<7x128xf32>
    %c0_8 = arith.constant 0 : index
    %c0_9 = arith.constant 0 : index
    %c0_10 = arith.constant 0 : index
    %12 = vector.load %arg4[%c0_8, %c0_9, %c0_10] : memref<8x1x128xf32, #tpu.memory_space<vmem>>, vector<1x1x128xf32>
    %13 = vector.shape_cast %12 : vector<1x1x128xf32> to vector<1x128xf32>
    %cst_11 = arith.constant 0.000000e+00 : f32
    %14 = vector.broadcast %cst_11 : f32 to vector<1x128xf32>
    %15 = arith.cmpf one, %13, %14 : vector<1x128xf32>
    %16 = vector.shape_cast %9 : vector<7x128xf32> to vector<7x1x128xf32>
    %17 = vector.broadcast %16 : vector<7x1x128xf32> to vector<7x7x128xf32>
    %18 = arith.addf %17, %2 : vector<7x7x128xf32>
    %19 = vector.shape_cast %11 : vector<7x128xf32> to vector<1x7x128xf32>
    %20 = vector.broadcast %19 : vector<1x7x128xf32> to vector<7x7x128xf32>
    %21 = arith.addf %18, %20 : vector<7x7x128xf32>
    %cst_12 = arith.constant dense<0xFF800000> : vector<7x128xf32>
    %22 = vector.multi_reduction <maximumf>, %21, %cst_12 [0] : vector<7x7x128xf32> to vector<7x128xf32>
    %23 = vector.shape_cast %22 : vector<7x128xf32> to vector<1x7x128xf32>
    %24 = vector.broadcast %23 : vector<1x7x128xf32> to vector<7x7x128xf32>
    %25 = arith.subf %21, %24 : vector<7x7x128xf32>
    %26 = math.exp %25 : vector<7x7x128xf32>
    %cst_13 = arith.constant dense<0.000000e+00> : vector<7x128xf32>
    %27 = vector.multi_reduction <add>, %26, %cst_13 [0] : vector<7x7x128xf32> to vector<7x128xf32>
    %28 = math.log %27 : vector<7x128xf32>
    %29 = arith.addf %22, %28 : vector<7x128xf32>
    %30 = vector.shape_cast %15 : vector<1x128xi1> to vector<1x128xi1>
    %31 = vector.broadcast %30 : vector<1x128xi1> to vector<7x128xi1>
    %32 = arith.select %31, %29, %9 : vector<7x128xi1>, vector<7x128xf32>
    %c1 = arith.constant 1 : index
    %c0_14 = arith.constant 0 : index
    %c0_15 = arith.constant 0 : index
    %33 = vector.load %arg1[%c1, %c0_14, %c0_15] : memref<8x7x128xf32, #tpu.memory_space<vmem>>, vector<1x7x128xf32>
    %34 = vector.shape_cast %33 : vector<1x7x128xf32> to vector<7x128xf32>
    %c1_16 = arith.constant 1 : index
    %c0_17 = arith.constant 0 : index
    %c0_18 = arith.constant 0 : index
    %35 = vector.load %arg4[%c1_16, %c0_17, %c0_18] : memref<8x1x128xf32, #tpu.memory_space<vmem>>, vector<1x1x128xf32>
    %36 = vector.shape_cast %35 : vector<1x1x128xf32> to vector<1x128xf32>
    %cst_19 = arith.constant 0.000000e+00 : f32
    %37 = vector.broadcast %cst_19 : f32 to vector<1x128xf32>
    %38 = arith.cmpf one, %36, %37 : vector<1x128xf32>
    %39 = vector.shape_cast %32 : vector<7x128xf32> to vector<7x1x128xf32>
    %40 = vector.broadcast %39 : vector<7x1x128xf32> to vector<7x7x128xf32>
    %41 = arith.addf %40, %2 : vector<7x7x128xf32>
    %42 = vector.shape_cast %34 : vector<7x128xf32> to vector<1x7x128xf32>
    %43 = vector.broadcast %42 : vector<1x7x128xf32> to vector<7x7x128xf32>
    %44 = arith.addf %41, %43 : vector<7x7x128xf32>
    %cst_20 = arith.constant dense<0xFF800000> : vector<7x128xf32>
    %45 = vector.multi_reduction <maximumf>, %44, %cst_20 [0] : vector<7x7x128xf32> to vector<7x128xf32>
    %46 = vector.shape_cast %45 : vector<7x128xf32> to vector<1x7x128xf32>
    %47 = vector.broadcast %46 : vector<1x7x128xf32> to vector<7x7x128xf32>
    %48 = arith.subf %44, %47 : vector<7x7x128xf32>
    %49 = math.exp %48 : vector<7x7x128xf32>
    %cst_21 = arith.constant dense<0.000000e+00> : vector<7x128xf32>
    %50 = vector.multi_reduction <add>, %49, %cst_21 [0] : vector<7x7x128xf32> to vector<7x128xf32>
    %51 = math.log %50 : vector<7x128xf32>
    %52 = arith.addf %45, %51 : vector<7x128xf32>
    %53 = vector.shape_cast %38 : vector<1x128xi1> to vector<1x128xi1>
    %54 = vector.broadcast %53 : vector<1x128xi1> to vector<7x128xi1>
    %55 = arith.select %54, %52, %32 : vector<7x128xi1>, vector<7x128xf32>
    %c2 = arith.constant 2 : index
    %c0_22 = arith.constant 0 : index
    %c0_23 = arith.constant 0 : index
    %56 = vector.load %arg1[%c2, %c0_22, %c0_23] : memref<8x7x128xf32, #tpu.memory_space<vmem>>, vector<1x7x128xf32>
    %57 = vector.shape_cast %56 : vector<1x7x128xf32> to vector<7x128xf32>
    %c2_24 = arith.constant 2 : index
    %c0_25 = arith.constant 0 : index
    %c0_26 = arith.constant 0 : index
    %58 = vector.load %arg4[%c2_24, %c0_25, %c0_26] : memref<8x1x128xf32, #tpu.memory_space<vmem>>, vector<1x1x128xf32>
    %59 = vector.shape_cast %58 : vector<1x1x128xf32> to vector<1x128xf32>
    %cst_27 = arith.constant 0.000000e+00 : f32
    %60 = vector.broadcast %cst_27 : f32 to vector<1x128xf32>
    %61 = arith.cmpf one, %59, %60 : vector<1x128xf32>
    %62 = vector.shape_cast %55 : vector<7x128xf32> to vector<7x1x128xf32>
    %63 = vector.broadcast %62 : vector<7x1x128xf32> to vector<7x7x128xf32>
    %64 = arith.addf %63, %2 : vector<7x7x128xf32>
    %65 = vector.shape_cast %57 : vector<7x128xf32> to vector<1x7x128xf32>
    %66 = vector.broadcast %65 : vector<1x7x128xf32> to vector<7x7x128xf32>
    %67 = arith.addf %64, %66 : vector<7x7x128xf32>
    %cst_28 = arith.constant dense<0xFF800000> : vector<7x128xf32>
    %68 = vector.multi_reduction <maximumf>, %67, %cst_28 [0] : vector<7x7x128xf32> to vector<7x128xf32>
    %69 = vector.shape_cast %68 : vector<7x128xf32> to vector<1x7x128xf32>
    %70 = vector.broadcast %69 : vector<1x7x128xf32> to vector<7x7x128xf32>
    %71 = arith.subf %67, %70 : vector<7x7x128xf32>
    %72 = math.exp %71 : vector<7x7x128xf32>
    %cst_29 = arith.constant dense<0.000000e+00> : vector<7x128xf32>
    %73 = vector.multi_reduction <add>, %72, %cst_29 [0] : vector<7x7x128xf32> to vector<7x128xf32>
    %74 = math.log %73 : vector<7x128xf32>
    %75 = arith.addf %68, %74 : vector<7x128xf32>
    %76 = vector.shape_cast %61 : vector<1x128xi1> to vector<1x128xi1>
    %77 = vector.broadcast %76 : vector<1x128xi1> to vector<7x128xi1>
    %78 = arith.select %77, %75, %55 : vector<7x128xi1>, vector<7x128xf32>
    %c3 = arith.constant 3 : index
    %c0_30 = arith.constant 0 : index
    %c0_31 = arith.constant 0 : index
    %79 = vector.load %arg1[%c3, %c0_30, %c0_31] : memref<8x7x128xf32, #tpu.memory_space<vmem>>, vector<1x7x128xf32>
    %80 = vector.shape_cast %79 : vector<1x7x128xf32> to vector<7x128xf32>
    %c3_32 = arith.constant 3 : index
    %c0_33 = arith.constant 0 : index
    %c0_34 = arith.constant 0 : index
    %81 = vector.load %arg4[%c3_32, %c0_33, %c0_34] : memref<8x1x128xf32, #tpu.memory_space<vmem>>, vector<1x1x128xf32>
    %82 = vector.shape_cast %81 : vector<1x1x128xf32> to vector<1x128xf32>
    %cst_35 = arith.constant 0.000000e+00 : f32
    %83 = vector.broadcast %cst_35 : f32 to vector<1x128xf32>
    %84 = arith.cmpf one, %82, %83 : vector<1x128xf32>
    %85 = vector.shape_cast %78 : vector<7x128xf32> to vector<7x1x128xf32>
    %86 = vector.broadcast %85 : vector<7x1x128xf32> to vector<7x7x128xf32>
    %87 = arith.addf %86, %2 : vector<7x7x128xf32>
    %88 = vector.shape_cast %80 : vector<7x128xf32> to vector<1x7x128xf32>
    %89 = vector.broadcast %88 : vector<1x7x128xf32> to vector<7x7x128xf32>
    %90 = arith.addf %87, %89 : vector<7x7x128xf32>
    %cst_36 = arith.constant dense<0xFF800000> : vector<7x128xf32>
    %91 = vector.multi_reduction <maximumf>, %90, %cst_36 [0] : vector<7x7x128xf32> to vector<7x128xf32>
    %92 = vector.shape_cast %91 : vector<7x128xf32> to vector<1x7x128xf32>
    %93 = vector.broadcast %92 : vector<1x7x128xf32> to vector<7x7x128xf32>
    %94 = arith.subf %90, %93 : vector<7x7x128xf32>
    %95 = math.exp %94 : vector<7x7x128xf32>
    %cst_37 = arith.constant dense<0.000000e+00> : vector<7x128xf32>
    %96 = vector.multi_reduction <add>, %95, %cst_37 [0] : vector<7x7x128xf32> to vector<7x128xf32>
    %97 = math.log %96 : vector<7x128xf32>
    %98 = arith.addf %91, %97 : vector<7x128xf32>
    %99 = vector.shape_cast %84 : vector<1x128xi1> to vector<1x128xi1>
    %100 = vector.broadcast %99 : vector<1x128xi1> to vector<7x128xi1>
    %101 = arith.select %100, %98, %78 : vector<7x128xi1>, vector<7x128xf32>
    %c4 = arith.constant 4 : index
    %c0_38 = arith.constant 0 : index
    %c0_39 = arith.constant 0 : index
    %102 = vector.load %arg1[%c4, %c0_38, %c0_39] : memref<8x7x128xf32, #tpu.memory_space<vmem>>, vector<1x7x128xf32>
    %103 = vector.shape_cast %102 : vector<1x7x128xf32> to vector<7x128xf32>
    %c4_40 = arith.constant 4 : index
    %c0_41 = arith.constant 0 : index
    %c0_42 = arith.constant 0 : index
    %104 = vector.load %arg4[%c4_40, %c0_41, %c0_42] : memref<8x1x128xf32, #tpu.memory_space<vmem>>, vector<1x1x128xf32>
    %105 = vector.shape_cast %104 : vector<1x1x128xf32> to vector<1x128xf32>
    %cst_43 = arith.constant 0.000000e+00 : f32
    %106 = vector.broadcast %cst_43 : f32 to vector<1x128xf32>
    %107 = arith.cmpf one, %105, %106 : vector<1x128xf32>
    %108 = vector.shape_cast %101 : vector<7x128xf32> to vector<7x1x128xf32>
    %109 = vector.broadcast %108 : vector<7x1x128xf32> to vector<7x7x128xf32>
    %110 = arith.addf %109, %2 : vector<7x7x128xf32>
    %111 = vector.shape_cast %103 : vector<7x128xf32> to vector<1x7x128xf32>
    %112 = vector.broadcast %111 : vector<1x7x128xf32> to vector<7x7x128xf32>
    %113 = arith.addf %110, %112 : vector<7x7x128xf32>
    %cst_44 = arith.constant dense<0xFF800000> : vector<7x128xf32>
    %114 = vector.multi_reduction <maximumf>, %113, %cst_44 [0] : vector<7x7x128xf32> to vector<7x128xf32>
    %115 = vector.shape_cast %114 : vector<7x128xf32> to vector<1x7x128xf32>
    %116 = vector.broadcast %115 : vector<1x7x128xf32> to vector<7x7x128xf32>
    %117 = arith.subf %113, %116 : vector<7x7x128xf32>
    %118 = math.exp %117 : vector<7x7x128xf32>
    %cst_45 = arith.constant dense<0.000000e+00> : vector<7x128xf32>
    %119 = vector.multi_reduction <add>, %118, %cst_45 [0] : vector<7x7x128xf32> to vector<7x128xf32>
    %120 = math.log %119 : vector<7x128xf32>
    %121 = arith.addf %114, %120 : vector<7x128xf32>
    %122 = vector.shape_cast %107 : vector<1x128xi1> to vector<1x128xi1>
    %123 = vector.broadcast %122 : vector<1x128xi1> to vector<7x128xi1>
    %124 = arith.select %123, %121, %101 : vector<7x128xi1>, vector<7x128xf32>
    %c5 = arith.constant 5 : index
    %c0_46 = arith.constant 0 : index
    %c0_47 = arith.constant 0 : index
    %125 = vector.load %arg1[%c5, %c0_46, %c0_47] : memref<8x7x128xf32, #tpu.memory_space<vmem>>, vector<1x7x128xf32>
    %126 = vector.shape_cast %125 : vector<1x7x128xf32> to vector<7x128xf32>
    %c5_48 = arith.constant 5 : index
    %c0_49 = arith.constant 0 : index
    %c0_50 = arith.constant 0 : index
    %127 = vector.load %arg4[%c5_48, %c0_49, %c0_50] : memref<8x1x128xf32, #tpu.memory_space<vmem>>, vector<1x1x128xf32>
    %128 = vector.shape_cast %127 : vector<1x1x128xf32> to vector<1x128xf32>
    %cst_51 = arith.constant 0.000000e+00 : f32
    %129 = vector.broadcast %cst_51 : f32 to vector<1x128xf32>
    %130 = arith.cmpf one, %128, %129 : vector<1x128xf32>
    %131 = vector.shape_cast %124 : vector<7x128xf32> to vector<7x1x128xf32>
    %132 = vector.broadcast %131 : vector<7x1x128xf32> to vector<7x7x128xf32>
    %133 = arith.addf %132, %2 : vector<7x7x128xf32>
    %134 = vector.shape_cast %126 : vector<7x128xf32> to vector<1x7x128xf32>
    %135 = vector.broadcast %134 : vector<1x7x128xf32> to vector<7x7x128xf32>
    %136 = arith.addf %133, %135 : vector<7x7x128xf32>
    %cst_52 = arith.constant dense<0xFF800000> : vector<7x128xf32>
    %137 = vector.multi_reduction <maximumf>, %136, %cst_52 [0] : vector<7x7x128xf32> to vector<7x128xf32>
    %138 = vector.shape_cast %137 : vector<7x128xf32> to vector<1x7x128xf32>
    %139 = vector.broadcast %138 : vector<1x7x128xf32> to vector<7x7x128xf32>
    %140 = arith.subf %136, %139 : vector<7x7x128xf32>
    %141 = math.exp %140 : vector<7x7x128xf32>
    %cst_53 = arith.constant dense<0.000000e+00> : vector<7x128xf32>
    %142 = vector.multi_reduction <add>, %141, %cst_53 [0] : vector<7x7x128xf32> to vector<7x128xf32>
    %143 = math.log %142 : vector<7x128xf32>
    %144 = arith.addf %137, %143 : vector<7x128xf32>
    %145 = vector.shape_cast %130 : vector<1x128xi1> to vector<1x128xi1>
    %146 = vector.broadcast %145 : vector<1x128xi1> to vector<7x128xi1>
    %147 = arith.select %146, %144, %124 : vector<7x128xi1>, vector<7x128xf32>
    %c6 = arith.constant 6 : index
    %c0_54 = arith.constant 0 : index
    %c0_55 = arith.constant 0 : index
    %148 = vector.load %arg1[%c6, %c0_54, %c0_55] : memref<8x7x128xf32, #tpu.memory_space<vmem>>, vector<1x7x128xf32>
    %149 = vector.shape_cast %148 : vector<1x7x128xf32> to vector<7x128xf32>
    %c6_56 = arith.constant 6 : index
    %c0_57 = arith.constant 0 : index
    %c0_58 = arith.constant 0 : index
    %150 = vector.load %arg4[%c6_56, %c0_57, %c0_58] : memref<8x1x128xf32, #tpu.memory_space<vmem>>, vector<1x1x128xf32>
    %151 = vector.shape_cast %150 : vector<1x1x128xf32> to vector<1x128xf32>
    %cst_59 = arith.constant 0.000000e+00 : f32
    %152 = vector.broadcast %cst_59 : f32 to vector<1x128xf32>
    %153 = arith.cmpf one, %151, %152 : vector<1x128xf32>
    %154 = vector.shape_cast %147 : vector<7x128xf32> to vector<7x1x128xf32>
    %155 = vector.broadcast %154 : vector<7x1x128xf32> to vector<7x7x128xf32>
    %156 = arith.addf %155, %2 : vector<7x7x128xf32>
    %157 = vector.shape_cast %149 : vector<7x128xf32> to vector<1x7x128xf32>
    %158 = vector.broadcast %157 : vector<1x7x128xf32> to vector<7x7x128xf32>
    %159 = arith.addf %156, %158 : vector<7x7x128xf32>
    %cst_60 = arith.constant dense<0xFF800000> : vector<7x128xf32>
    %160 = vector.multi_reduction <maximumf>, %159, %cst_60 [0] : vector<7x7x128xf32> to vector<7x128xf32>
    %161 = vector.shape_cast %160 : vector<7x128xf32> to vector<1x7x128xf32>
    %162 = vector.broadcast %161 : vector<1x7x128xf32> to vector<7x7x128xf32>
    %163 = arith.subf %159, %162 : vector<7x7x128xf32>
    %164 = math.exp %163 : vector<7x7x128xf32>
    %cst_61 = arith.constant dense<0.000000e+00> : vector<7x128xf32>
    %165 = vector.multi_reduction <add>, %164, %cst_61 [0] : vector<7x7x128xf32> to vector<7x128xf32>
    %166 = math.log %165 : vector<7x128xf32>
    %167 = arith.addf %160, %166 : vector<7x128xf32>
    %168 = vector.shape_cast %153 : vector<1x128xi1> to vector<1x128xi1>
    %169 = vector.broadcast %168 : vector<1x128xi1> to vector<7x128xi1>
    %170 = arith.select %169, %167, %147 : vector<7x128xi1>, vector<7x128xf32>
    %c7 = arith.constant 7 : index
    %c0_62 = arith.constant 0 : index
    %c0_63 = arith.constant 0 : index
    %171 = vector.load %arg1[%c7, %c0_62, %c0_63] : memref<8x7x128xf32, #tpu.memory_space<vmem>>, vector<1x7x128xf32>
    %172 = vector.shape_cast %171 : vector<1x7x128xf32> to vector<7x128xf32>
    %c7_64 = arith.constant 7 : index
    %c0_65 = arith.constant 0 : index
    %c0_66 = arith.constant 0 : index
    %173 = vector.load %arg4[%c7_64, %c0_65, %c0_66] : memref<8x1x128xf32, #tpu.memory_space<vmem>>, vector<1x1x128xf32>
    %174 = vector.shape_cast %173 : vector<1x1x128xf32> to vector<1x128xf32>
    %cst_67 = arith.constant 0.000000e+00 : f32
    %175 = vector.broadcast %cst_67 : f32 to vector<1x128xf32>
    %176 = arith.cmpf one, %174, %175 : vector<1x128xf32>
    %177 = vector.shape_cast %170 : vector<7x128xf32> to vector<7x1x128xf32>
    %178 = vector.broadcast %177 : vector<7x1x128xf32> to vector<7x7x128xf32>
    %179 = arith.addf %178, %2 : vector<7x7x128xf32>
    %180 = vector.shape_cast %172 : vector<7x128xf32> to vector<1x7x128xf32>
    %181 = vector.broadcast %180 : vector<1x7x128xf32> to vector<7x7x128xf32>
    %182 = arith.addf %179, %181 : vector<7x7x128xf32>
    %cst_68 = arith.constant dense<0xFF800000> : vector<7x128xf32>
    %183 = vector.multi_reduction <maximumf>, %182, %cst_68 [0] : vector<7x7x128xf32> to vector<7x128xf32>
    %184 = vector.shape_cast %183 : vector<7x128xf32> to vector<1x7x128xf32>
    %185 = vector.broadcast %184 : vector<1x7x128xf32> to vector<7x7x128xf32>
    %186 = arith.subf %182, %185 : vector<7x7x128xf32>
    %187 = math.exp %186 : vector<7x7x128xf32>
    %cst_69 = arith.constant dense<0.000000e+00> : vector<7x128xf32>
    %188 = vector.multi_reduction <add>, %187, %cst_69 [0] : vector<7x7x128xf32> to vector<7x128xf32>
    %189 = math.log %188 : vector<7x128xf32>
    %190 = arith.addf %183, %189 : vector<7x128xf32>
    %191 = vector.shape_cast %176 : vector<1x128xi1> to vector<1x128xi1>
    %192 = vector.broadcast %191 : vector<1x128xi1> to vector<7x128xi1>
    %193 = arith.select %192, %190, %170 : vector<7x128xi1>, vector<7x128xf32>
    %194 = vector.broadcast %3 : vector<7x1xf32> to vector<7x128xf32>
    %195 = arith.addf %193, %194 : vector<7x128xf32>
    %cst_70 = arith.constant dense<0xFF800000> : vector<128xf32>
    %196 = vector.multi_reduction <maximumf>, %195, %cst_70 [0] : vector<7x128xf32> to vector<128xf32>
    %197 = vector.shape_cast %196 : vector<128xf32> to vector<1x128xf32>
    %198 = vector.broadcast %197 : vector<1x128xf32> to vector<7x128xf32>
    %199 = arith.subf %195, %198 : vector<7x128xf32>
    %200 = math.exp %199 : vector<7x128xf32>
    %cst_71 = arith.constant dense<0.000000e+00> : vector<128xf32>
    %201 = vector.multi_reduction <add>, %200, %cst_71 [0] : vector<7x128xf32> to vector<128xf32>
    %202 = vector.shape_cast %201 : vector<128xf32> to vector<1x128xf32>
    %203 = math.log %202 : vector<1x128xf32>
    %204 = arith.addf %197, %203 : vector<1x128xf32>
    %c0_72 = arith.constant 0 : index
    %c0_73 = arith.constant 0 : index
    %c0_74 = arith.constant 0 : index
    %205 = vector.load %arg2[%c0_72, %c0_73, %c0_74] : memref<8x1x128xi32, #tpu.memory_space<vmem>>, vector<8x1x128xi32>
    %c0_75 = arith.constant 0 : index
    %c0_76 = arith.constant 0 : index
    %c0_77 = arith.constant 0 : index
    %206 = vector.load %arg3[%c0_75, %c0_76, %c0_77] : memref<8x1x128xi32, #tpu.memory_space<vmem>>, vector<8x1x128xi32>
    %c0_78 = arith.constant 0 : index
    %c0_79 = arith.constant 0 : index
    %c0_80 = arith.constant 0 : index
    %207 = vector.load %arg4[%c0_78, %c0_79, %c0_80] : memref<8x1x128xf32, #tpu.memory_space<vmem>>, vector<8x1x128xf32>
    %cst_81 = arith.constant 0.000000e+00 : f32
    %208 = vector.broadcast %cst_81 : f32 to vector<8x1x128xf32>
    %209 = arith.cmpf one, %207, %208 : vector<8x1x128xf32>
    %210 = tpu.iota {dimensions = array<i32: 1>} : vector<8x7x128xi32>
    %c0_i32 = arith.constant 0 : i32
    %211 = vector.broadcast %c0_i32 : i32 to vector<8x1x128xi32>
    %212 = arith.cmpi eq, %205, %211 : vector<8x1x128xi32>
    %213 = vector.extract_strided_slice %0 {offsets = [0, 0, 0], sizes = [1, 7, 1], strides = [1, 1, 1]} : vector<7x7x1xf32> to vector<1x7x1xf32>
    %214 = vector.shape_cast %213 : vector<1x7x1xf32> to vector<7x1xf32>
    %215 = vector.shape_cast %214 : vector<7x1xf32> to vector<1x7x1xf32>
    %cst_82 = arith.constant 0.000000e+00 : f32
    %216 = vector.shape_cast %212 : vector<8x1x128xi1> to vector<8x1x128xi1>
    %217 = vector.broadcast %216 : vector<8x1x128xi1> to vector<8x7x128xi1>
    %218 = vector.shape_cast %215 : vector<1x7x1xf32> to vector<1x7x1xf32>
    %219 = vector.broadcast %218 : vector<1x7x1xf32> to vector<8x7x128xf32>
    %220 = vector.broadcast %cst_82 : f32 to vector<8x7x128xf32>
    %221 = arith.select %217, %219, %220 : vector<8x7x128xi1>, vector<8x7x128xf32>
    %c1_i32 = arith.constant 1 : i32
    %222 = vector.broadcast %c1_i32 : i32 to vector<8x1x128xi32>
    %223 = arith.cmpi eq, %205, %222 : vector<8x1x128xi32>
    %224 = vector.extract_strided_slice %0 {offsets = [1, 0, 0], sizes = [1, 7, 1], strides = [1, 1, 1]} : vector<7x7x1xf32> to vector<1x7x1xf32>
    %225 = vector.shape_cast %224 : vector<1x7x1xf32> to vector<7x1xf32>
    %226 = vector.shape_cast %225 : vector<7x1xf32> to vector<1x7x1xf32>
    %227 = vector.shape_cast %223 : vector<8x1x128xi1> to vector<8x1x128xi1>
    %228 = vector.broadcast %227 : vector<8x1x128xi1> to vector<8x7x128xi1>
    %229 = vector.shape_cast %226 : vector<1x7x1xf32> to vector<1x7x1xf32>
    %230 = vector.broadcast %229 : vector<1x7x1xf32> to vector<8x7x128xf32>
    %231 = arith.select %228, %230, %221 : vector<8x7x128xi1>, vector<8x7x128xf32>
    %c2_i32 = arith.constant 2 : i32
    %232 = vector.broadcast %c2_i32 : i32 to vector<8x1x128xi32>
    %233 = arith.cmpi eq, %205, %232 : vector<8x1x128xi32>
    %234 = vector.extract_strided_slice %0 {offsets = [2, 0, 0], sizes = [1, 7, 1], strides = [1, 1, 1]} : vector<7x7x1xf32> to vector<1x7x1xf32>
    %235 = vector.shape_cast %234 : vector<1x7x1xf32> to vector<7x1xf32>
    %236 = vector.shape_cast %235 : vector<7x1xf32> to vector<1x7x1xf32>
    %237 = vector.shape_cast %233 : vector<8x1x128xi1> to vector<8x1x128xi1>
    %238 = vector.broadcast %237 : vector<8x1x128xi1> to vector<8x7x128xi1>
    %239 = vector.shape_cast %236 : vector<1x7x1xf32> to vector<1x7x1xf32>
    %240 = vector.broadcast %239 : vector<1x7x1xf32> to vector<8x7x128xf32>
    %241 = arith.select %238, %240, %231 : vector<8x7x128xi1>, vector<8x7x128xf32>
    %c3_i32 = arith.constant 3 : i32
    %242 = vector.broadcast %c3_i32 : i32 to vector<8x1x128xi32>
    %243 = arith.cmpi eq, %205, %242 : vector<8x1x128xi32>
    %244 = vector.extract_strided_slice %0 {offsets = [3, 0, 0], sizes = [1, 7, 1], strides = [1, 1, 1]} : vector<7x7x1xf32> to vector<1x7x1xf32>
    %245 = vector.shape_cast %244 : vector<1x7x1xf32> to vector<7x1xf32>
    %246 = vector.shape_cast %245 : vector<7x1xf32> to vector<1x7x1xf32>
    %247 = vector.shape_cast %243 : vector<8x1x128xi1> to vector<8x1x128xi1>
    %248 = vector.broadcast %247 : vector<8x1x128xi1> to vector<8x7x128xi1>
    %249 = vector.shape_cast %246 : vector<1x7x1xf32> to vector<1x7x1xf32>
    %250 = vector.broadcast %249 : vector<1x7x1xf32> to vector<8x7x128xf32>
    %251 = arith.select %248, %250, %241 : vector<8x7x128xi1>, vector<8x7x128xf32>
    %c4_i32 = arith.constant 4 : i32
    %252 = vector.broadcast %c4_i32 : i32 to vector<8x1x128xi32>
    %253 = arith.cmpi eq, %205, %252 : vector<8x1x128xi32>
    %254 = vector.extract_strided_slice %0 {offsets = [4, 0, 0], sizes = [1, 7, 1], strides = [1, 1, 1]} : vector<7x7x1xf32> to vector<1x7x1xf32>
    %255 = vector.shape_cast %254 : vector<1x7x1xf32> to vector<7x1xf32>
    %256 = vector.shape_cast %255 : vector<7x1xf32> to vector<1x7x1xf32>
    %257 = vector.shape_cast %253 : vector<8x1x128xi1> to vector<8x1x128xi1>
    %258 = vector.broadcast %257 : vector<8x1x128xi1> to vector<8x7x128xi1>
    %259 = vector.shape_cast %256 : vector<1x7x1xf32> to vector<1x7x1xf32>
    %260 = vector.broadcast %259 : vector<1x7x1xf32> to vector<8x7x128xf32>
    %261 = arith.select %258, %260, %251 : vector<8x7x128xi1>, vector<8x7x128xf32>
    %c5_i32_83 = arith.constant 5 : i32
    %262 = vector.broadcast %c5_i32_83 : i32 to vector<8x1x128xi32>
    %263 = arith.cmpi eq, %205, %262 : vector<8x1x128xi32>
    %264 = vector.extract_strided_slice %0 {offsets = [5, 0, 0], sizes = [1, 7, 1], strides = [1, 1, 1]} : vector<7x7x1xf32> to vector<1x7x1xf32>
    %265 = vector.shape_cast %264 : vector<1x7x1xf32> to vector<7x1xf32>
    %266 = vector.shape_cast %265 : vector<7x1xf32> to vector<1x7x1xf32>
    %267 = vector.shape_cast %263 : vector<8x1x128xi1> to vector<8x1x128xi1>
    %268 = vector.broadcast %267 : vector<8x1x128xi1> to vector<8x7x128xi1>
    %269 = vector.shape_cast %266 : vector<1x7x1xf32> to vector<1x7x1xf32>
    %270 = vector.broadcast %269 : vector<1x7x1xf32> to vector<8x7x128xf32>
    %271 = arith.select %268, %270, %261 : vector<8x7x128xi1>, vector<8x7x128xf32>
    %c6_i32 = arith.constant 6 : i32
    %272 = vector.broadcast %c6_i32 : i32 to vector<8x1x128xi32>
    %273 = arith.cmpi eq, %205, %272 : vector<8x1x128xi32>
    %274 = vector.extract_strided_slice %0 {offsets = [6, 0, 0], sizes = [1, 7, 1], strides = [1, 1, 1]} : vector<7x7x1xf32> to vector<1x7x1xf32>
    %275 = vector.shape_cast %274 : vector<1x7x1xf32> to vector<7x1xf32>
    %276 = vector.shape_cast %275 : vector<7x1xf32> to vector<1x7x1xf32>
    %277 = vector.shape_cast %273 : vector<8x1x128xi1> to vector<8x1x128xi1>
    %278 = vector.broadcast %277 : vector<8x1x128xi1> to vector<8x7x128xi1>
    %279 = vector.shape_cast %276 : vector<1x7x1xf32> to vector<1x7x1xf32>
    %280 = vector.broadcast %279 : vector<1x7x1xf32> to vector<8x7x128xf32>
    %281 = arith.select %278, %280, %271 : vector<8x7x128xi1>, vector<8x7x128xf32>
    %282 = vector.broadcast %206 : vector<8x1x128xi32> to vector<8x7x128xi32>
    %283 = arith.cmpi eq, %210, %282 : vector<8x7x128xi32>
    %cst_84 = arith.constant 0.000000e+00 : f32
    %284 = vector.broadcast %cst_84 : f32 to vector<8x7x128xf32>
    %285 = arith.select %283, %281, %284 : vector<8x7x128xi1>, vector<8x7x128xf32>
    %cst_85 = arith.constant dense<0.000000e+00> : vector<8x128xf32>
    %286 = vector.multi_reduction <add>, %285, %cst_85 [1] : vector<8x7x128xf32> to vector<8x128xf32>
    %287 = vector.shape_cast %286 : vector<8x128xf32> to vector<8x1x128xf32>
    %288 = vector.broadcast %205 : vector<8x1x128xi32> to vector<8x7x128xi32>
    %289 = arith.cmpi eq, %210, %288 : vector<8x7x128xi32>
    %c0_86 = arith.constant 0 : index
    %c0_87 = arith.constant 0 : index
    %c0_88 = arith.constant 0 : index
    %290 = vector.load %arg1[%c0_86, %c0_87, %c0_88] : memref<8x7x128xf32, #tpu.memory_space<vmem>>, vector<8x7x128xf32>
    %cst_89 = arith.constant 0.000000e+00 : f32
    %291 = vector.broadcast %cst_89 : f32 to vector<8x7x128xf32>
    %292 = arith.select %289, %290, %291 : vector<8x7x128xi1>, vector<8x7x128xf32>
    %cst_90 = arith.constant dense<0.000000e+00> : vector<8x128xf32>
    %293 = vector.multi_reduction <add>, %292, %cst_90 [1] : vector<8x7x128xf32> to vector<8x128xf32>
    %294 = vector.shape_cast %293 : vector<8x128xf32> to vector<8x1x128xf32>
    %295 = arith.addf %287, %294 : vector<8x1x128xf32>
    %cst_91 = arith.constant 0.000000e+00 : f32
    %296 = vector.broadcast %cst_91 : f32 to vector<8x1x128xf32>
    %297 = arith.select %209, %295, %296 : vector<8x1x128xi1>, vector<8x1x128xf32>
    %cst_92 = arith.constant dense<0.000000e+00> : vector<1x128xf32>
    %298 = vector.multi_reduction <add>, %297, %cst_92 [0] : vector<8x1x128xf32> to vector<1x128xf32>
    %cst_93 = arith.constant dense<0.000000e+00> : vector<1x128xf32>
    %299 = vector.multi_reduction <add>, %207, %cst_93 [0] : vector<8x1x128xf32> to vector<1x128xf32>
    %300 = arith.fptosi %299 : vector<1x128xf32> to vector<1x128xi32>
    %301 = tpu.iota {dimensions = array<i32: 0>} : vector<8x1x128xi32>
    %c1_i32_94 = arith.constant 1 : i32
    %302 = vector.broadcast %c1_i32_94 : i32 to vector<1x128xi32>
    %303 = arith.subi %300, %302 : vector<1x128xi32>
    %304 = vector.shape_cast %303 : vector<1x128xi32> to vector<1x1x128xi32>
    %305 = vector.broadcast %304 : vector<1x1x128xi32> to vector<8x1x128xi32>
    %306 = arith.cmpi eq, %301, %305 : vector<8x1x128xi32>
    %c0_i32_95 = arith.constant 0 : i32
    %307 = vector.broadcast %c0_i32_95 : i32 to vector<8x1x128xi32>
    %308 = arith.select %306, %205, %307 : vector<8x1x128xi1>, vector<8x1x128xi32>
    %cst_96 = arith.constant dense<0> : vector<1x128xi32>
    %309 = vector.multi_reduction <add>, %308, %cst_96 [0] : vector<8x1x128xi32> to vector<1x128xi32>
    %310 = vector.broadcast %309 : vector<1x128xi32> to vector<7x128xi32>
    %311 = arith.cmpi eq, %4, %310 : vector<7x128xi32>
    %cst_97 = arith.constant 0.000000e+00 : f32
    %312 = vector.shape_cast %3 : vector<7x1xf32> to vector<7x1xf32>
    %313 = vector.broadcast %312 : vector<7x1xf32> to vector<7x128xf32>
    %314 = vector.broadcast %cst_97 : f32 to vector<7x128xf32>
    %315 = arith.select %311, %313, %314 : vector<7x128xi1>, vector<7x128xf32>
    %cst_98 = arith.constant dense<0.000000e+00> : vector<128xf32>
    %316 = vector.multi_reduction <add>, %315, %cst_98 [0] : vector<7x128xf32> to vector<128xf32>
    %317 = vector.shape_cast %316 : vector<128xf32> to vector<1x128xf32>
    %318 = arith.addf %298, %317 : vector<1x128xf32>
    %319 = arith.subf %204, %318 : vector<1x128xf32>
    %c0_99 = arith.constant 0 : index
    %c0_100 = arith.constant 0 : index
    %320 = vector.load %arg7[%c0_99, %c0_100] : memref<1x128xf32, #tpu.memory_space<vmem>>, vector<1x128xf32>
    tpu.vector_store %arg7[%c0_99, %c0_100], %319 {strides = array<i32>} : memref<1x128xf32, #tpu.memory_space<vmem>>, vector<1x128xf32>,
    return
  }
  func.func @transform_0(%arg0: i32) -> (i32, i32, i32) {
    %c0_i32 = arith.constant 0 : i32
    %c0_i32_0 = arith.constant 0 : i32
    %c0_i32_1 = arith.constant 0 : i32
    return %c0_i32, %c0_i32_0, %arg0 : i32, i32, i32
  }
  func.func @transform_1(%arg0: i32) -> (i32, i32, i32) {
    %c0_i32 = arith.constant 0 : i32
    %c0_i32_0 = arith.constant 0 : i32
    %c0_i32_1 = arith.constant 0 : i32
    return %c0_i32, %c0_i32_0, %arg0 : i32, i32, i32
  }
  func.func @transform_2(%arg0: i32) -> (i32, i32, i32) {
    %c0_i32 = arith.constant 0 : i32
    %c0_i32_0 = arith.constant 0 : i32
    %c0_i32_1 = arith.constant 0 : i32
    return %c0_i32, %c0_i32_0, %arg0 : i32, i32, i32
  }
  func.func @transform_3(%arg0: i32) -> (i32, i32, i32) {
    %c0_i32 = arith.constant 0 : i32
    %c0_i32_0 = arith.constant 0 : i32
    %c0_i32_1 = arith.constant 0 : i32
    return %c0_i32, %c0_i32_0, %arg0 : i32, i32, i32
  }
  func.func @transform_4(%arg0: i32) -> (i32, i32, i32) {
    %c0_i32 = arith.constant 0 : i32
    %c0_i32_0 = arith.constant 0 : i32
    %c0_i32_1 = arith.constant 0 : i32
    %c0_i32_2 = arith.constant 0 : i32
    return %c0_i32, %c0_i32_0, %c0_i32_1 : i32, i32, i32
  }
  func.func @transform_5(%arg0: i32) -> (i32, i32) {
    %c0_i32 = arith.constant 0 : i32
    %c0_i32_0 = arith.constant 0 : i32
    %c0_i32_1 = arith.constant 0 : i32
    return %c0_i32, %c0_i32_0 : i32, i32
  }
  func.func @transform_6(%arg0: i32) -> (i32, i32) {
    %c0_i32 = arith.constant 0 : i32
    %c0_i32_0 = arith.constant 0 : i32
    return %c0_i32, %arg0 : i32, i32
  }
}

</mosaic_0001>

<bundles_post_ra>
// kernel: tpu_custom_call.1
= control target key start
LH: loop header
LB: loop body
LE: loop exit
PB: predicated region body
PF: predicated region fallthrough
CT: control target
= control target key end

     0   :  { %v3096_v2 = vmov 0   ;;  %s3088_s0 = inlined_call_operand.vmem [shape: f32[8,7,128], index: 0, kind: input, shape index: {}]   ;;  %s3089_s1 = inlined_call_operand.vmem [shape: s32[8,1,128], index: 1, kind: input, shape index: {}]   ;;  %s3090_s2 = inlined_call_operand.vmem [shape: s32[8,1,128], index: 2, kind: input, shape index: {}]   ;;  %s3091_s3 = inlined_call_operand.vmem [shape: f32[8,1,128], index: 3, kind: input, shape index: {}]   ;;  %s3092_s4 = inlined_call_operand.vmem [shape: f32[7,7,1], index: 4, kind: input, shape index: {}]   ;;  %s3093_s5 = inlined_call_operand.vmem [shape: f32[7,1], index: 5, kind: input, shape index: {}]   ;;  %s3094_s6 = inlined_call_operand.hbm [shape: f32[1,128], index: 6, kind: output, shape index: {}]  }
   0x1   :  { %v26_v0 = vld [vmem:[%s3092_s4 + $0x10] sm:$0x7f]  ;;  %v24_v1 = vld [vmem:[%s3092_s4] sm:$0x7f]  ;;  %1455 = vset.pattern.permute.xlu1 %v3096_v2  ;;  %1454 = vset.pattern.permute.xlu0 %v3096_v2  ;;  %v29_v3 = vld [vmem:[%s3092_s4 + $0x28] sm:$0x7f] }
   0x2   :  { %43 = vperm.xlu1 %1455, %v26_v0   ;;  %33 = vperm.xlu0 %1454, %v24_v1  }
   0x3   :  { %1456 = vset.pattern.permute.xlu2 %v3096_v2 }
   0x4   :  { %11 = vsyncpa [#allocation3], 0  ;;  %58 = vperm.xlu2 %1456, %v29_v3   ;;  %v28_v4 = vld [vmem:[%s3092_s4 + $0x20] sm:$0x7f]  ;;  %v25_v5 = vld [vmem:[%s3092_s4 + $0x8] sm:$0x7f]  ;;  %v67_v9 = vlaneseq }
   0x5   :  { %v30_v6 = vld [vmem:[%s3092_s4 + $0x30] sm:$0x7f]  ;;  %v66_v7 = vld [vmem:[%s3093_s5] sm:$0x7f]  ;;  %v27_v8 = vld [vmem:[%s3092_s4 + $0x18] sm:$0x7f] }
   0x6   :  { %v1706_v11 = vshrl.u32 %v67_v9, 7  ;;  %v1640_v14 = vmov -10000.0   ;;  %v71_v31 = vld [vmem:[%s3088_s0] sm:$0x7f]  ;;  %vm3095_vm1 = vcmask 1046528  }
   0x8   :  { %vm69_vm0 = vcmp.eq.s32.totalorder %v1706_v11, 5 }
   0x9   :  { %v1713_v15 = vsel %vm69_vm0, 0.0, %v1640_v14 }
   0xa   :  { %53 = vperm.xlu1 %1455, %v28_v4   ;;  %38 = vperm.xlu0 %1454, %v25_v5   ;;  %v80_v16 = vperm.slane %v1713_v15, 5  ;;  %v81_v17 = vperm.slane %v1713_v15, 6  ;;  %v75_v19 = vperm.slane %v1713_v15, 0  ;;  %v76_v20 = vperm.slane %v1713_v15, 1 }
   0xb   :  { %v77_v21 = vperm.slane %v1713_v15, 2  ;;  %v79_v22 = vperm.slane %v1713_v15, 4  ;;  %v78_v35 = vperm.slane %v1713_v15, 3 }
   0xc   :  { %63 = vperm.xlu2 %1456, %v30_v6  }
  0x12   :  { %818 = vperm.xlu1 %1455, %v66_v7   ;;  %48 = vperm.xlu0 %1454, %v27_v8  }
  0x5e   :  { %v1704_v10 = vpop.permute.xlu2 %58 }
  0x5f   :  { %v94_v25 = vadd.f32 %v80_v16, %v1704_v10 }
  0x61   :  { %v101_v34 = vadd.f32 %v94_v25, %v71_v31 }
  0x63   :  { %v110_v42 = vsel %vm3095_vm1, %v101_v34, -inf }
  0x66   :  { %v1717_v18 = vpop.permute.xlu2 %63 }
  0x67   :  { %v95_v26 = vadd.f32 %v81_v17, %v1717_v18 }
  0x69   :  { %v102_v38 = vadd.f32 %v95_v26, %v71_v31 }
  0x6b   :  { %v112_v46 = vsel %vm3095_vm1, %v102_v38, -inf }
  0x74   :  { %v1709_v12 = vpop.permute.xlu1 %43  ;;  %v1711_v13 = vpop.permute.xlu0 %33 }
  0x75   :  { %v89_v27 = vadd.f32 %v75_v19, %v1711_v13  ;;  %v91_v29 = vadd.f32 %v77_v21, %v1709_v12 }
  0x77   :  { %v96_v36 = vadd.f32 %v89_v27, %v71_v31  ;;  %v98_v37 = vadd.f32 %v91_v29, %v71_v31 }
  0x79   :  { %v104_v44 = vsel %vm3095_vm1, %v96_v36, -inf  ;;  %v106_v45 = vsel %vm3095_vm1, %v98_v37, -inf }
  0x7a   :  { %v113_v50 = vmax.f32 %v106_v45, %v112_v46 }
  0x7c   :  { %v1723_v23 = vpop.permute.xlu1 %53  ;;  %v1725_v24 = vpop.permute.xlu0 %38 }
  0x7d   :  { %v90_v28 = vadd.f32 %v76_v20, %v1725_v24  ;;  %v93_v30 = vadd.f32 %v79_v22, %v1723_v23 }
  0x7f   :  { %v97_v32 = vadd.f32 %v90_v28, %v71_v31  ;;  %v100_v33 = vadd.f32 %v93_v30, %v71_v31  ;;  %v72_v30 = vld [vmem:[%s3091_s3] sm:$0x1] }
  0x80   :  { %vm73_vm2 = vcmp.ne.f32.partialorder %v72_v30, 0.0 }
  0x81   :  { %v105_v39 = vsel %vm3095_vm1, %v97_v32, -inf  ;;  %v108_v40 = vsel %vm3095_vm1, %v100_v33, -inf }
  0x82   :  { %v109_v47 = vmax.f32 %v104_v44, %v108_v40  ;;  %v111_v48 = vmax.f32 %v105_v39, %v110_v42 }
  0x84   :  { %v1739_v41 = vpop.permute.xlu0 %48  ;;  %v114_v52 = vmax.f32 %v109_v47, %v111_v48 }
  0x85   :  { %v92_v43 = vadd.f32 %v78_v35, %v1739_v41  ;;  %v154_v35 = vsel %vm73_vm2, 1, %v3096_v2 }
  0x87   :  { %v99_v49 = vadd.f32 %v92_v43, %v71_v31 }
  0x89   :  { %v107_v51 = vsel %vm3095_vm1, %v99_v49, -inf }
  0x8a   :  { %v115_v53 = vmax.f32 %v113_v50, %v107_v51 }
  0x8c   :  { %v116_v54 = vmax.f32 %v114_v52, %v115_v53 }
  0x8e   :  { %v117_v55 = vsub.f32 %v96_v36, %v116_v54  ;;  %v118_v56 = vsub.f32 %v97_v32, %v116_v54  ;;  %v119_v57 = vsub.f32 %v98_v37, %v116_v54  ;;  %v120_v58 = vsub.f32 %v99_v49, %v116_v54  ;;  %v1431_v49 = vld [vmem:[%s3088_s0 + $0x8] sm:$0x7f] }
  0x8f   :  { %v121_v59 = vsub.f32 %v100_v33, %v116_v54  ;;  %v122_v63 = vsub.f32 %v101_v34, %v116_v54  ;;  %v123_v1 = vsub.f32 %v102_v38, %v116_v54  ;;  %v155_v36 = vperm.slane %v154_v35, 0 }
  0x90   :  { %v124_v60 = vmul.f32 1.442695, %v117_v55  ;;  %v126_v61 = vmul.f32 1.442695, %v118_v56  ;;  %v128_v62 = vmul.f32 1.442695, %v119_v57 }
  0x91   :  { %v130_v0 = vmul.f32 1.442695, %v120_v58  ;;  %v132_v3 = vmul.f32 1.442695, %v121_v59  ;;  %v134_v4 = vmul.f32 1.442695, %v122_v63 }
  0x92   :  { %1473 = vpow2.f32 %v124_v60  ;;  %v136_v5 = vmul.f32 1.442695, %v123_v1  ;;  %vm156_vm3 = vcmp.eq.s32.totalorder %v155_v36, 1 }
  0x93   :  { %1475 = vpow2.f32 %v126_v61 }
  0x94   :  { %1477 = vpow2.f32 %v128_v62 }
  0x95   :  { %1479 = vpow2.f32 %v130_v0 }
  0x96   :  { %1481 = vpow2.f32 %v132_v3 }
  0x97   :  { %1483 = vpow2.f32 %v134_v4 }
  0x98   :  { %v1474_v6 = vpop.eup %1473  ;;  %1485 = vpow2.f32 %v136_v5 }
  0x99   :  { %v1476_v7 = vpop.eup %1475  ;;  %v138_v8 = vsel %vm3095_vm1, %v1474_v6, 0.0 }
  0x9a   :  { %v1478_v9 = vpop.eup %1477  ;;  %v139_v14 = vsel %vm3095_vm1, %v1476_v7, 0.0 }
  0x9b   :  { %v1480_v16 = vpop.eup %1479  ;;  %v140_v17 = vadd.f32 %v139_v14, %v138_v8  ;;  %v141_v19 = vsel %vm3095_vm1, %v1478_v9, 0.0 }
  0x9c   :  { %v1482_v20 = vpop.eup %1481  ;;  %v143_v22 = vsel %vm3095_vm1, %v1480_v16, 0.0 }
  0x9d   :  { %v142_v21 = vadd.f32 %v141_v19, %v140_v17  ;;  %v1484_v25 = vpop.eup %1483  ;;  %v145_v27 = vsel %vm3095_vm1, %v1482_v20, 0.0 }
  0x9e   :  { %v1486_v28 = vpop.eup %1485  ;;  %v147_v31 = vsel %vm3095_vm1, %v1484_v25, 0.0 }
  0x9f   :  { %v144_v26 = vadd.f32 %v143_v22, %v142_v21  ;;  %v149_v33 = vsel %vm3095_vm1, %v1486_v28, 0.0 }
  0xa1   :  { %v146_v29 = vadd.f32 %v145_v27, %v144_v26 }
  0xa3   :  { %v148_v32 = vadd.f32 %v147_v31, %v146_v29 }
  0xa5   :  { %v150_v34 = vadd.f32 %v149_v33, %v148_v32 }
  0xa7   :  { %1487 = vlog2.f32 %v150_v34 }
  0xad   :  { %v1488_v37 = vpop.eup %1487 }
  0xae   :  { %v152_v38 = vmul.f32 0.6931472, %v1488_v37 }
  0xb0   :  { %v153_v39 = vadd.f32 %v152_v38, %v116_v54 }
  0xb2   :  { %v1759_v40 = vsel %vm156_vm3, %v153_v39, %v1713_v15 }
  0xb3   :  { %v164_v42 = vrot.slane %v1759_v40, 1  ;;  %v165_v43 = vrot.slane %v1759_v40, 2  ;;  %v166_v44 = vrot.slane %v1759_v40, 3  ;;  %v167_v45 = vrot.slane %v1759_v40, 4 }
  0xb4   :  { %v168_v46 = vrot.slane %v1759_v40, 5  ;;  %v169_v47 = vrot.slane %v1759_v40, 6  ;;  %v170_v48 = vperm.slane %v1759_v40, 0 }
  0xb5   :  { %v171_v15 = vperm.slane %v164_v42, 0  ;;  %v172_v50 = vperm.slane %v165_v43, 0  ;;  %v173_v51 = vperm.slane %v166_v44, 0  ;;  %v174_v52 = vperm.slane %v167_v45, 0 }
  0xb6   :  { %v175_v53 = vperm.slane %v168_v46, 0  ;;  %v176_v54 = vperm.slane %v169_v47, 0  ;;  %v184_v55 = vadd.f32 %v170_v48, %v1711_v13 }
  0xb7   :  { %v185_v56 = vadd.f32 %v171_v15, %v1725_v24  ;;  %v186_v57 = vadd.f32 %v172_v50, %v1709_v12  ;;  %v187_v58 = vadd.f32 %v173_v51, %v1739_v41  ;;  %v188_v59 = vadd.f32 %v174_v52, %v1723_v23 }
  0xb8   :  { %v189_v60 = vadd.f32 %v175_v53, %v1704_v10  ;;  %v190_v61 = vadd.f32 %v176_v54, %v1717_v18  ;;  %v191_v62 = vadd.f32 %v1431_v49, %v184_v55 }
  0xb9   :  { %v192_v63 = vadd.f32 %v1431_v49, %v185_v56  ;;  %v193_v0 = vadd.f32 %v1431_v49, %v186_v57  ;;  %v195_v1 = vadd.f32 %v1431_v49, %v188_v59  ;;  %v194_v3 = vadd.f32 %v1431_v49, %v187_v58  ;;  %v1432_v58 = vld [vmem:[%s3091_s3 + $0x1] sm:$0x1] }
  0xba   :  { %v196_v4 = vadd.f32 %v1431_v49, %v189_v60  ;;  %v197_v5 = vadd.f32 %v1431_v49, %v190_v61  ;;  %v198_v6 = vsel %vm3095_vm1, %v191_v62, -inf  ;;  %vm162_vm4 = vcmp.ne.f32.partialorder %v1432_v58, 0.0 }
  0xbb   :  { %v199_v7 = vsel %vm3095_vm1, %v192_v63, -inf  ;;  %v200_v8 = vsel %vm3095_vm1, %v193_v0, -inf  ;;  %v202_v9 = vsel %vm3095_vm1, %v195_v1, -inf  ;;  %v201_v21 = vsel %vm3095_vm1, %v194_v3, -inf }
  0xbc   :  { %v203_v14 = vmax.f32 %v198_v6, %v202_v9  ;;  %v204_v16 = vsel %vm3095_vm1, %v196_v4, -inf  ;;  %v206_v17 = vsel %vm3095_vm1, %v197_v5, -inf }
  0xbd   :  { %v205_v19 = vmax.f32 %v199_v7, %v204_v16  ;;  %v207_v20 = vmax.f32 %v200_v8, %v206_v17 }
  0xbf   :  { %v208_v22 = vmax.f32 %v203_v14, %v205_v19  ;;  %v209_v25 = vmax.f32 %v207_v20, %v201_v21  ;;  %v1433_v19 = vld [vmem:[%s3088_s0 + $0x10] sm:$0x7f] }
  0xc1   :  { %v210_v26 = vmax.f32 %v208_v22, %v209_v25 }
  0xc3   :  { %v211_v27 = vsub.f32 %v191_v62, %v210_v26  ;;  %v212_v28 = vsub.f32 %v192_v63, %v210_v26  ;;  %v213_v29 = vsub.f32 %v193_v0, %v210_v26  ;;  %v214_v30 = vsub.f32 %v194_v3, %v210_v26 }
  0xc4   :  { %v215_v31 = vsub.f32 %v195_v1, %v210_v26  ;;  %v216_v35 = vsub.f32 %v196_v4, %v210_v26  ;;  %v217_v37 = vsub.f32 %v197_v5, %v210_v26  ;;  %v248_v63 = vsel %vm162_vm4, 1, %v3096_v2 }
  0xc5   :  { %v218_v32 = vmul.f32 1.442695, %v211_v27  ;;  %v220_v33 = vmul.f32 1.442695, %v212_v28  ;;  %v222_v34 = vmul.f32 1.442695, %v213_v29 }
  0xc6   :  { %v224_v36 = vmul.f32 1.442695, %v214_v30  ;;  %v226_v38 = vmul.f32 1.442695, %v215_v31  ;;  %v228_v39 = vmul.f32 1.442695, %v216_v35 }
  0xc7   :  { %1489 = vpow2.f32 %v218_v32  ;;  %v230_v42 = vmul.f32 1.442695, %v217_v37  ;;  %v249_v0 = vperm.slane %v248_v63, 0 }
  0xc8   :  { %1491 = vpow2.f32 %v220_v33 }
  0xc9   :  { %1493 = vpow2.f32 %v222_v34  ;;  %vm250_vm5 = vcmp.eq.s32.totalorder %v249_v0, 1 }
  0xca   :  { %1495 = vpow2.f32 %v224_v36 }
  0xcb   :  { %1497 = vpow2.f32 %v226_v38 }
  0xcc   :  { %1499 = vpow2.f32 %v228_v39 }
  0xcd   :  { %v1490_v43 = vpop.eup %1489  ;;  %1501 = vpow2.f32 %v230_v42 }
  0xce   :  { %v1492_v44 = vpop.eup %1491  ;;  %v232_v45 = vsel %vm3095_vm1, %v1490_v43, 0.0 }
  0xcf   :  { %v1494_v46 = vpop.eup %1493  ;;  %v233_v47 = vsel %vm3095_vm1, %v1492_v44, 0.0 }
  0xd0   :  { %v1496_v48 = vpop.eup %1495  ;;  %v234_v49 = vadd.f32 %v233_v47, %v232_v45  ;;  %v235_v15 = vsel %vm3095_vm1, %v1494_v46, 0.0 }
  0xd1   :  { %v1498_v50 = vpop.eup %1497  ;;  %v237_v52 = vsel %vm3095_vm1, %v1496_v48, 0.0 }
  0xd2   :  { %v236_v51 = vadd.f32 %v235_v15, %v234_v49  ;;  %v1500_v53 = vpop.eup %1499  ;;  %v239_v55 = vsel %vm3095_vm1, %v1498_v50, 0.0 }
  0xd3   :  { %v1502_v56 = vpop.eup %1501  ;;  %v241_v59 = vsel %vm3095_vm1, %v1500_v53, 0.0 }
  0xd4   :  { %v238_v54 = vadd.f32 %v237_v52, %v236_v51  ;;  %v243_v61 = vsel %vm3095_vm1, %v1502_v56, 0.0 }
  0xd6   :  { %v240_v57 = vadd.f32 %v239_v55, %v238_v54 }
  0xd8   :  { %v242_v60 = vadd.f32 %v241_v59, %v240_v57 }
  0xda   :  { %v244_v62 = vadd.f32 %v243_v61, %v242_v60 }
  0xdc   :  { %1503 = vlog2.f32 %v244_v62 }
  0xe2   :  { %v1504_v1 = vpop.eup %1503 }
  0xe3   :  { %v246_v3 = vmul.f32 0.6931472, %v1504_v1 }
  0xe5   :  { %v247_v4 = vadd.f32 %v246_v3, %v210_v26 }
  0xe7   :  { %v1797_v5 = vsel %vm250_vm5, %v247_v4, %v1759_v40 }
  0xe8   :  { %v258_v6 = vrot.slane %v1797_v5, 1  ;;  %v259_v7 = vrot.slane %v1797_v5, 2  ;;  %v260_v8 = vrot.slane %v1797_v5, 3  ;;  %v261_v9 = vrot.slane %v1797_v5, 4 }
  0xe9   :  { %v262_v14 = vrot.slane %v1797_v5, 5  ;;  %v263_v16 = vrot.slane %v1797_v5, 6  ;;  %v264_v17 = vperm.slane %v1797_v5, 0 }
  0xea   :  { %v265_v40 = vperm.slane %v258_v6, 0  ;;  %v266_v20 = vperm.slane %v259_v7, 0  ;;  %v267_v21 = vperm.slane %v260_v8, 0  ;;  %v268_v22 = vperm.slane %v261_v9, 0 }
  0xeb   :  { %v269_v25 = vperm.slane %v262_v14, 0  ;;  %v270_v26 = vperm.slane %v263_v16, 0  ;;  %v278_v27 = vadd.f32 %v264_v17, %v1711_v13 }
  0xec   :  { %v279_v28 = vadd.f32 %v265_v40, %v1725_v24  ;;  %v280_v29 = vadd.f32 %v266_v20, %v1709_v12  ;;  %v281_v30 = vadd.f32 %v267_v21, %v1739_v41  ;;  %v282_v31 = vadd.f32 %v268_v22, %v1723_v23 }
  0xed   :  { %v283_v32 = vadd.f32 %v269_v25, %v1704_v10  ;;  %v284_v33 = vadd.f32 %v270_v26, %v1717_v18  ;;  %v285_v34 = vadd.f32 %v1433_v19, %v278_v27 }
  0xee   :  { %v286_v35 = vadd.f32 %v1433_v19, %v279_v28  ;;  %v287_v36 = vadd.f32 %v1433_v19, %v280_v29  ;;  %v289_v37 = vadd.f32 %v1433_v19, %v282_v31  ;;  %v288_v38 = vadd.f32 %v1433_v19, %v281_v30  ;;  %v1434_v30 = vld [vmem:[%s3091_s3 + $0x2] sm:$0x1] }
  0xef   :  { %v290_v39 = vadd.f32 %v1433_v19, %v283_v32  ;;  %v291_v42 = vadd.f32 %v1433_v19, %v284_v33  ;;  %v292_v43 = vsel %vm3095_vm1, %v285_v34, -inf  ;;  %vm256_vm6 = vcmp.ne.f32.partialorder %v1434_v30, 0.0 }
  0xf0   :  { %v293_v44 = vsel %vm3095_vm1, %v286_v35, -inf  ;;  %v294_v45 = vsel %vm3095_vm1, %v287_v36, -inf  ;;  %v296_v46 = vsel %vm3095_vm1, %v289_v37, -inf  ;;  %v295_v51 = vsel %vm3095_vm1, %v288_v38, -inf }
  0xf1   :  { %v297_v47 = vmax.f32 %v292_v43, %v296_v46  ;;  %v298_v48 = vsel %vm3095_vm1, %v290_v39, -inf  ;;  %v300_v49 = vsel %vm3095_vm1, %v291_v42, -inf }
  0xf2   :  { %v299_v15 = vmax.f32 %v293_v44, %v298_v48  ;;  %v301_v50 = vmax.f32 %v294_v45, %v300_v49 }
  0xf4   :  { %v302_v52 = vmax.f32 %v297_v47, %v299_v15  ;;  %v303_v53 = vmax.f32 %v301_v50, %v295_v51  ;;  %v1435_v15 = vld [vmem:[%s3088_s0 + $0x18] sm:$0x7f] }
  0xf6   :  { %v304_v54 = vmax.f32 %v302_v52, %v303_v53 }
  0xf8   :  { %v305_v55 = vsub.f32 %v285_v34, %v304_v54  ;;  %v306_v56 = vsub.f32 %v286_v35, %v304_v54  ;;  %v307_v57 = vsub.f32 %v287_v36, %v304_v54  ;;  %v308_v58 = vsub.f32 %v288_v38, %v304_v54 }
  0xf9   :  { %v309_v59 = vsub.f32 %v289_v37, %v304_v54  ;;  %v310_v63 = vsub.f32 %v290_v39, %v304_v54  ;;  %v311_v1 = vsub.f32 %v291_v42, %v304_v54  ;;  %v342_v35 = vsel %vm256_vm6, 1, %v3096_v2 }
  0xfa   :  { %v312_v60 = vmul.f32 1.442695, %v305_v55  ;;  %v314_v61 = vmul.f32 1.442695, %v306_v56  ;;  %v316_v62 = vmul.f32 1.442695, %v307_v57 }
  0xfb   :  { %v318_v0 = vmul.f32 1.442695, %v308_v58  ;;  %v320_v3 = vmul.f32 1.442695, %v309_v59  ;;  %v322_v4 = vmul.f32 1.442695, %v310_v63 }
  0xfc   :  { %1505 = vpow2.f32 %v312_v60  ;;  %v324_v6 = vmul.f32 1.442695, %v311_v1  ;;  %v343_v36 = vperm.slane %v342_v35, 0 }
  0xfd   :  { %1507 = vpow2.f32 %v314_v61 }
  0xfe   :  { %1509 = vpow2.f32 %v316_v62  ;;  %vm344_vm7 = vcmp.eq.s32.totalorder %v343_v36, 1 }
  0xff   :  { %1511 = vpow2.f32 %v318_v0 }
 0x100   :  { %1513 = vpow2.f32 %v320_v3 }
 0x101   :  { %1515 = vpow2.f32 %v322_v4 }
 0x102   :  { %v1506_v7 = vpop.eup %1505  ;;  %1517 = vpow2.f32 %v324_v6 }
 0x103   :  { %v1508_v8 = vpop.eup %1507  ;;  %v326_v9 = vsel %vm3095_vm1, %v1506_v7, 0.0 }
 0x104   :  { %v1510_v14 = vpop.eup %1509  ;;  %v327_v16 = vsel %vm3095_vm1, %v1508_v8, 0.0 }
 0x105   :  { %v1512_v17 = vpop.eup %1511  ;;  %v328_v19 = vadd.f32 %v327_v16, %v326_v9  ;;  %v329_v40 = vsel %vm3095_vm1, %v1510_v14, 0.0 }
 0x106   :  { %v1514_v20 = vpop.eup %1513  ;;  %v331_v22 = vsel %vm3095_vm1, %v1512_v17, 0.0 }
 0x107   :  { %v330_v21 = vadd.f32 %v329_v40, %v328_v19  ;;  %v1516_v25 = vpop.eup %1515  ;;  %v333_v27 = vsel %vm3095_vm1, %v1514_v20, 0.0 }
 0x108   :  { %v1518_v28 = vpop.eup %1517  ;;  %v335_v31 = vsel %vm3095_vm1, %v1516_v25, 0.0 }
 0x109   :  { %v332_v26 = vadd.f32 %v331_v22, %v330_v21  ;;  %v337_v33 = vsel %vm3095_vm1, %v1518_v28, 0.0 }
 0x10b   :  { %v334_v29 = vadd.f32 %v333_v27, %v332_v26 }
 0x10d   :  { %v336_v32 = vadd.f32 %v335_v31, %v334_v29 }
 0x10f   :  { %v338_v34 = vadd.f32 %v337_v33, %v336_v32 }
 0x111   :  { %1519 = vlog2.f32 %v338_v34 }
 0x117   :  { %v1520_v37 = vpop.eup %1519 }
 0x118   :  { %v340_v38 = vmul.f32 0.6931472, %v1520_v37 }
 0x11a   :  { %v341_v39 = vadd.f32 %v340_v38, %v304_v54 }
 0x11c   :  { %v1835_v42 = vsel %vm344_vm7, %v341_v39, %v1797_v5 }
 0x11d   :  { %v352_v43 = vrot.slane %v1835_v42, 1  ;;  %v353_v44 = vrot.slane %v1835_v42, 2  ;;  %v354_v45 = vrot.slane %v1835_v42, 3  ;;  %v355_v46 = vrot.slane %v1835_v42, 4 }
 0x11e   :  { %v356_v47 = vrot.slane %v1835_v42, 5  ;;  %v357_v48 = vrot.slane %v1835_v42, 6  ;;  %v358_v49 = vperm.slane %v1835_v42, 0 }
 0x11f   :  { %v359_v5 = vperm.slane %v352_v43, 0  ;;  %v360_v50 = vperm.slane %v353_v44, 0  ;;  %v361_v51 = vperm.slane %v354_v45, 0  ;;  %v362_v52 = vperm.slane %v355_v46, 0 }
 0x120   :  { %v363_v53 = vperm.slane %v356_v47, 0  ;;  %v364_v54 = vperm.slane %v357_v48, 0  ;;  %v372_v55 = vadd.f32 %v358_v49, %v1711_v13 }
 0x121   :  { %v373_v56 = vadd.f32 %v359_v5, %v1725_v24  ;;  %v374_v57 = vadd.f32 %v360_v50, %v1709_v12  ;;  %v375_v58 = vadd.f32 %v361_v51, %v1739_v41  ;;  %v376_v59 = vadd.f32 %v362_v52, %v1723_v23 }
 0x122   :  { %v377_v60 = vadd.f32 %v363_v53, %v1704_v10  ;;  %v378_v61 = vadd.f32 %v364_v54, %v1717_v18  ;;  %v379_v62 = vadd.f32 %v1435_v15, %v372_v55 }
 0x123   :  { %v380_v63 = vadd.f32 %v1435_v15, %v373_v56  ;;  %v381_v0 = vadd.f32 %v1435_v15, %v374_v57  ;;  %v383_v1 = vadd.f32 %v1435_v15, %v376_v59  ;;  %v382_v3 = vadd.f32 %v1435_v15, %v375_v58  ;;  %v1436_v58 = vld [vmem:[%s3091_s3 + $0x3] sm:$0x1] }
 0x124   :  { %v384_v4 = vadd.f32 %v1435_v15, %v377_v60  ;;  %v385_v6 = vadd.f32 %v1435_v15, %v378_v61  ;;  %v386_v7 = vsel %vm3095_vm1, %v379_v62, -inf  ;;  %vm350_vm8 = vcmp.ne.f32.partialorder %v1436_v58, 0.0 }
 0x125   :  { %v387_v8 = vsel %vm3095_vm1, %v380_v63, -inf  ;;  %v388_v9 = vsel %vm3095_vm1, %v381_v0, -inf  ;;  %v390_v14 = vsel %vm3095_vm1, %v383_v1, -inf  ;;  %v389_v21 = vsel %vm3095_vm1, %v382_v3, -inf }
 0x126   :  { %v391_v16 = vmax.f32 %v386_v7, %v390_v14  ;;  %v392_v17 = vsel %vm3095_vm1, %v384_v4, -inf  ;;  %v394_v19 = vsel %vm3095_vm1, %v385_v6, -inf }
 0x127   :  { %v393_v40 = vmax.f32 %v387_v8, %v392_v17  ;;  %v395_v20 = vmax.f32 %v388_v9, %v394_v19 }
 0x129   :  { %v396_v22 = vmax.f32 %v391_v16, %v393_v40  ;;  %v397_v25 = vmax.f32 %v395_v20, %v389_v21  ;;  %v1437_v40 = vld [vmem:[%s3088_s0 + $0x20] sm:$0x7f] }
 0x12b   :  { %v398_v26 = vmax.f32 %v396_v22, %v397_v25 }
 0x12d   :  { %v399_v27 = vsub.f32 %v379_v62, %v398_v26  ;;  %v400_v28 = vsub.f32 %v380_v63, %v398_v26  ;;  %v401_v29 = vsub.f32 %v381_v0, %v398_v26  ;;  %v402_v30 = vsub.f32 %v382_v3, %v398_v26 }
 0x12e   :  { %v403_v31 = vsub.f32 %v383_v1, %v398_v26  ;;  %v404_v35 = vsub.f32 %v384_v4, %v398_v26  ;;  %v405_v37 = vsub.f32 %v385_v6, %v398_v26  ;;  %v436_v63 = vsel %vm350_vm8, 1, %v3096_v2 }
 0x12f   :  { %v406_v32 = vmul.f32 1.442695, %v399_v27  ;;  %v408_v33 = vmul.f32 1.442695, %v400_v28  ;;  %v410_v34 = vmul.f32 1.442695, %v401_v29 }
 0x130   :  { %v412_v36 = vmul.f32 1.442695, %v402_v30  ;;  %v414_v38 = vmul.f32 1.442695, %v403_v31  ;;  %v416_v39 = vmul.f32 1.442695, %v404_v35 }
 0x131   :  { %1521 = vpow2.f32 %v406_v32  ;;  %v418_v43 = vmul.f32 1.442695, %v405_v37  ;;  %v437_v0 = vperm.slane %v436_v63, 0 }
 0x132   :  { %1523 = vpow2.f32 %v408_v33 }
 0x133   :  { %1525 = vpow2.f32 %v410_v34  ;;  %vm438_vm9 = vcmp.eq.s32.totalorder %v437_v0, 1 }
 0x134   :  { %1527 = vpow2.f32 %v412_v36 }
 0x135   :  { %1529 = vpow2.f32 %v414_v38 }
 0x136   :  { %1531 = vpow2.f32 %v416_v39 }
 0x137   :  { %v1522_v44 = vpop.eup %1521  ;;  %1533 = vpow2.f32 %v418_v43 }
 0x138   :  { %v1524_v45 = vpop.eup %1523  ;;  %v420_v46 = vsel %vm3095_vm1, %v1522_v44, 0.0 }
 0x139   :  { %v1526_v47 = vpop.eup %1525  ;;  %v421_v48 = vsel %vm3095_vm1, %v1524_v45, 0.0 }
 0x13a   :  { %v1528_v49 = vpop.eup %1527  ;;  %v422_v15 = vadd.f32 %v421_v48, %v420_v46  ;;  %v423_v5 = vsel %vm3095_vm1, %v1526_v47, 0.0 }
 0x13b   :  { %v1530_v50 = vpop.eup %1529  ;;  %v425_v52 = vsel %vm3095_vm1, %v1528_v49, 0.0 }
 0x13c   :  { %v424_v51 = vadd.f32 %v423_v5, %v422_v15  ;;  %v1532_v53 = vpop.eup %1531  ;;  %v427_v55 = vsel %vm3095_vm1, %v1530_v50, 0.0 }
 0x13d   :  { %v1534_v56 = vpop.eup %1533  ;;  %v429_v59 = vsel %vm3095_vm1, %v1532_v53, 0.0 }
 0x13e   :  { %v426_v54 = vadd.f32 %v425_v52, %v424_v51  ;;  %v431_v61 = vsel %vm3095_vm1, %v1534_v56, 0.0 }
 0x140   :  { %v428_v57 = vadd.f32 %v427_v55, %v426_v54 }
 0x142   :  { %v430_v60 = vadd.f32 %v429_v59, %v428_v57 }
 0x144   :  { %v432_v62 = vadd.f32 %v431_v61, %v430_v60 }
 0x146   :  { %1535 = vlog2.f32 %v432_v62 }
 0x14c   :  { %v1536_v1 = vpop.eup %1535 }
 0x14d   :  { %v434_v3 = vmul.f32 0.6931472, %v1536_v1 }
 0x14f   :  { %v435_v4 = vadd.f32 %v434_v3, %v398_v26 }
 0x151   :  { %v1873_v6 = vsel %vm438_vm9, %v435_v4, %v1835_v42 }
 0x152   :  { %v446_v7 = vrot.slane %v1873_v6, 1  ;;  %v447_v8 = vrot.slane %v1873_v6, 2  ;;  %v448_v9 = vrot.slane %v1873_v6, 3  ;;  %v449_v14 = vrot.slane %v1873_v6, 4 }
 0x153   :  { %v450_v16 = vrot.slane %v1873_v6, 5  ;;  %v451_v17 = vrot.slane %v1873_v6, 6  ;;  %v452_v19 = vperm.slane %v1873_v6, 0 }
 0x154   :  { %v453_v42 = vperm.slane %v446_v7, 0  ;;  %v454_v20 = vperm.slane %v447_v8, 0  ;;  %v455_v21 = vperm.slane %v448_v9, 0  ;;  %v456_v22 = vperm.slane %v449_v14, 0 }
 0x155   :  { %v457_v25 = vperm.slane %v450_v16, 0  ;;  %v458_v26 = vperm.slane %v451_v17, 0  ;;  %v466_v27 = vadd.f32 %v452_v19, %v1711_v13 }
 0x156   :  { %v467_v28 = vadd.f32 %v453_v42, %v1725_v24  ;;  %v468_v29 = vadd.f32 %v454_v20, %v1709_v12  ;;  %v469_v30 = vadd.f32 %v455_v21, %v1739_v41  ;;  %v470_v31 = vadd.f32 %v456_v22, %v1723_v23 }
 0x157   :  { %v471_v32 = vadd.f32 %v457_v25, %v1704_v10  ;;  %v472_v33 = vadd.f32 %v458_v26, %v1717_v18  ;;  %v473_v34 = vadd.f32 %v1437_v40, %v466_v27 }
 0x158   :  { %v474_v35 = vadd.f32 %v1437_v40, %v467_v28  ;;  %v475_v36 = vadd.f32 %v1437_v40, %v468_v29  ;;  %v477_v37 = vadd.f32 %v1437_v40, %v470_v31  ;;  %v476_v38 = vadd.f32 %v1437_v40, %v469_v30  ;;  %v1438_v30 = vld [vmem:[%s3091_s3 + $0x4] sm:$0x1] }
 0x159   :  { %v478_v39 = vadd.f32 %v1437_v40, %v471_v32  ;;  %v479_v43 = vadd.f32 %v1437_v40, %v472_v33  ;;  %v480_v44 = vsel %vm3095_vm1, %v473_v34, -inf  ;;  %vm444_vm10 = vcmp.ne.f32.partialorder %v1438_v30, 0.0 }
 0x15a   :  { %v481_v45 = vsel %vm3095_vm1, %v474_v35, -inf  ;;  %v482_v46 = vsel %vm3095_vm1, %v475_v36, -inf  ;;  %v484_v47 = vsel %vm3095_vm1, %v477_v37, -inf  ;;  %v483_v51 = vsel %vm3095_vm1, %v476_v38, -inf }
 0x15b   :  { %v485_v48 = vmax.f32 %v480_v44, %v484_v47  ;;  %v486_v49 = vsel %vm3095_vm1, %v478_v39, -inf  ;;  %v488_v15 = vsel %vm3095_vm1, %v479_v43, -inf }
 0x15c   :  { %v487_v5 = vmax.f32 %v481_v45, %v486_v49  ;;  %v489_v50 = vmax.f32 %v482_v46, %v488_v15  ;;  %v1923_v45 = vld [vmem:[%s3089_s1 + $0x2] sm:$0x1] }
 0x15d   :  { %vm876_vm14 = vcmp.eq.s32.totalorder %v1923_v45, 0 }
 0x15e   :  { %v490_v52 = vmax.f32 %v485_v48, %v487_v5  ;;  %v491_v53 = vmax.f32 %v489_v50, %v483_v51  ;;  %v1937_v5 = vld [vmem:[%s3089_s1 + $0x3] sm:$0x1] }
 0x15f   :  { %vm877_vm15 = vcmp.eq.s32.totalorder %v1937_v5, 0 }
 0x160   :  { %v492_v54 = vmax.f32 %v490_v52, %v491_v53  ;;  %v1945_v52 = vld [vmem:[%s3089_s1 + $0x4] sm:$0x1]  ;;  %v1439_v53 = vld [vmem:[%s3088_s0 + $0x28] sm:$0x7f] }
 0x161   :  { %vm878_vm0 = vcmp.eq.s32.totalorder %v1945_v52, 0 }
 0x162   :  { %v493_v55 = vsub.f32 %v473_v34, %v492_v54  ;;  %v494_v56 = vsub.f32 %v474_v35, %v492_v54  ;;  %v495_v57 = vsub.f32 %v475_v36, %v492_v54  ;;  %v496_v58 = vsub.f32 %v476_v38, %v492_v54 }
 0x163   :  { %v497_v59 = vsub.f32 %v477_v37, %v492_v54  ;;  %v498_v63 = vsub.f32 %v478_v39, %v492_v54  ;;  %v499_v1 = vsub.f32 %v479_v43, %v492_v54  ;;  %v530_v35 = vsel %vm444_vm10, 1, %v3096_v2  ;;  %v1913_v39 = vld [vmem:[%s3089_s1] sm:$0x1]  ;;  %v1918_v43 = vld [vmem:[%s3089_s1 + $0x1] sm:$0x1] }
 0x164   :  { %v500_v60 = vmul.f32 1.442695, %v493_v55  ;;  %v502_v61 = vmul.f32 1.442695, %v494_v56  ;;  %v504_v62 = vmul.f32 1.442695, %v495_v57 }
 0x165   :  { %v506_v0 = vmul.f32 1.442695, %v496_v58  ;;  %v508_v3 = vmul.f32 1.442695, %v497_v59  ;;  %v510_v4 = vmul.f32 1.442695, %v498_v63 }
 0x166   :  { %1537 = vpow2.f32 %v500_v60  ;;  %v512_v7 = vmul.f32 1.442695, %v499_v1  ;;  %v531_v36 = vperm.slane %v530_v35, 0  ;;  %vm874_vm12 = vcmp.eq.s32.totalorder %v1913_v39, 0 }
 0x167   :  { %1539 = vpow2.f32 %v502_v61  ;;  %vm875_vm13 = vcmp.eq.s32.totalorder %v1918_v43, 0  ;;  %v1955_v61 = vld [vmem:[%s3089_s1 + $0x5] sm:$0x1]  ;;  %v885_v35 = vsel %vm877_vm15, 1, %v3096_v2  ;;  %vm914_vm6 = vcmp.eq.s32.totalorder %v1913_v39, 1 }
 0x168   :  { %1541 = vpow2.f32 %v504_v62  ;;  %vm532_vm11 = vcmp.eq.s32.totalorder %v531_v36, 1  ;;  %vm879_vm2 = vcmp.eq.s32.totalorder %v1955_v61, 0  ;;  %v886_v36 = vsel %vm878_vm0, 1, %v3096_v2 }
 0x169   :  { %1543 = vpow2.f32 %v506_v0  ;;  %vm918_vm15 = vcmp.eq.s32.totalorder %v1945_v52, 1  ;;  %vm919_vm0 = vcmp.eq.s32.totalorder %v1955_v61, 1 }
 0x16a   :  { %1545 = vpow2.f32 %v508_v3  ;;  %v1965_v3 = vld [vmem:[%s3089_s1 + $0x6] sm:$0x1] }
 0x16b   :  { %1547 = vpow2.f32 %v510_v4  ;;  %vm880_vm3 = vcmp.eq.s32.totalorder %v1965_v3, 0 }
 0x16c   :  { %v1538_v8 = vpop.eup %1537  ;;  %1549 = vpow2.f32 %v512_v7 }
 0x16d   :  { %v1540_v9 = vpop.eup %1539  ;;  %v514_v14 = vsel %vm3095_vm1, %v1538_v8, 0.0 }
 0x16e   :  { %v1542_v16 = vpop.eup %1541  ;;  %v515_v17 = vsel %vm3095_vm1, %v1540_v9, 0.0 }
 0x16f   :  { %v1544_v19 = vpop.eup %1543  ;;  %v516_v40 = vadd.f32 %v515_v17, %v514_v14  ;;  %v517_v42 = vsel %vm3095_vm1, %v1542_v16, 0.0  ;;  %v1973_v17 = vld [vmem:[%s3089_s1 + $0x7] sm:$0x1] }
 0x170   :  { %v1546_v20 = vpop.eup %1545  ;;  %v519_v22 = vsel %vm3095_vm1, %v1544_v19, 0.0  ;;  %vm881_vm4 = vcmp.eq.s32.totalorder %v1973_v17, 0 }
 0x171   :  { %v518_v21 = vadd.f32 %v517_v42, %v516_v40  ;;  %v1548_v25 = vpop.eup %1547  ;;  %v521_v27 = vsel %vm3095_vm1, %v1546_v20, 0.0 }
 0x172   :  { %v1550_v28 = vpop.eup %1549  ;;  %v523_v31 = vsel %vm3095_vm1, %v1548_v25, 0.0 }
 0x173   :  { %v520_v26 = vadd.f32 %v519_v22, %v518_v21  ;;  %v525_v33 = vsel %vm3095_vm1, %v1550_v28, 0.0 }
 0x175   :  { %v522_v29 = vadd.f32 %v521_v27, %v520_v26 }
 0x177   :  { %v524_v32 = vadd.f32 %v523_v31, %v522_v29  ;;  %v882_v31 = vsel %vm874_vm12, 1, %v3096_v2  ;;  %vm915_vm12 = vcmp.eq.s32.totalorder %v1918_v43, 1 }
 0x179   :  { %v526_v34 = vadd.f32 %v525_v33, %v524_v32  ;;  %v883_v32 = vsel %vm875_vm13, 1, %v3096_v2  ;;  %vm916_vm13 = vcmp.eq.s32.totalorder %v1923_v45, 1 }
 0x17b   :  { %1551 = vlog2.f32 %v526_v34  ;;  %v884_v34 = vsel %vm876_vm14, 1, %v3096_v2  ;;  %vm917_vm14 = vcmp.eq.s32.totalorder %v1937_v5, 1 }
 0x181   :  { %v1552_v37 = vpop.eup %1551 }
 0x182   :  { %v528_v38 = vmul.f32 0.6931472, %v1552_v37 }
 0x184   :  { %v529_v44 = vadd.f32 %v528_v38, %v492_v54 }
 0x186   :  { %v1926_v46 = vsel %vm532_vm11, %v529_v44, %v1873_v6  ;;  %v887_v44 = vsel %vm879_vm2, 1, %v3096_v2  ;;  %vm920_vm2 = vcmp.eq.s32.totalorder %v1965_v3, 1 }
 0x187   :  { %v540_v47 = vrot.slane %v1926_v46, 1  ;;  %v541_v48 = vrot.slane %v1926_v46, 2  ;;  %v542_v49 = vrot.slane %v1926_v46, 3  ;;  %v543_v15 = vrot.slane %v1926_v46, 4 }
 0x188   :  { %v544_v6 = vrot.slane %v1926_v46, 5  ;;  %v545_v50 = vrot.slane %v1926_v46, 6  ;;  %v546_v51 = vperm.slane %v1926_v46, 0 }
 0x189   :  { %v547_v54 = vperm.slane %v540_v47, 0  ;;  %v548_v55 = vperm.slane %v541_v48, 0  ;;  %v549_v56 = vperm.slane %v542_v49, 0  ;;  %v550_v57 = vperm.slane %v543_v15, 0 }
 0x18a   :  { %v551_v58 = vperm.slane %v544_v6, 0  ;;  %v552_v59 = vperm.slane %v545_v50, 0  ;;  %v560_v60 = vadd.f32 %v546_v51, %v1711_v13  ;;  %v888_v47 = vsel %vm880_vm3, 1, %v3096_v2 }
 0x18b   :  { %v561_v62 = vadd.f32 %v547_v54, %v1725_v24  ;;  %v562_v63 = vadd.f32 %v548_v55, %v1709_v12  ;;  %v563_v0 = vadd.f32 %v549_v56, %v1739_v41  ;;  %v564_v1 = vadd.f32 %v550_v57, %v1723_v23 }
 0x18c   :  { %v565_v4 = vadd.f32 %v551_v58, %v1704_v10  ;;  %v566_v7 = vadd.f32 %v552_v59, %v1717_v18  ;;  %v567_v8 = vadd.f32 %v1439_v53, %v560_v60  ;;  %v890_v48 = vperm.slane %v882_v31, 0 }
 0x18d   :  { %v568_v9 = vadd.f32 %v1439_v53, %v561_v62  ;;  %v569_v14 = vadd.f32 %v1439_v53, %v562_v63  ;;  %v571_v16 = vadd.f32 %v1439_v53, %v564_v1  ;;  %v570_v19 = vadd.f32 %v1439_v53, %v563_v0 }
 0x18e   :  { %v1976_v40 = vadd.f32 %v1439_v53, %v565_v4  ;;  %v1978_v42 = vadd.f32 %v1439_v53, %v566_v7  ;;  %v574_v20 = vsel %vm3095_vm1, %v567_v8, -inf  ;;  %v889_v15 = vsel %vm881_vm4, 1, %v3096_v2 }
 0x18f   :  { %v575_v21 = vsel %vm3095_vm1, %v568_v9, -inf  ;;  %v576_v22 = vsel %vm3095_vm1, %v569_v14, -inf  ;;  %v578_v25 = vsel %vm3095_vm1, %v571_v16, -inf  ;;  %v577_v33 = vsel %vm3095_vm1, %v570_v19, -inf }
 0x190   :  { %v579_v26 = vmax.f32 %v574_v20, %v578_v25  ;;  %v580_v27 = vsel %vm3095_vm1, %v1976_v40, -inf  ;;  %v582_v28 = vsel %vm3095_vm1, %v1978_v42, -inf  ;;  %v891_v6 = vperm.slane %v883_v32, 0 }
 0x191   :  { %v581_v29 = vmax.f32 %v575_v21, %v580_v27  ;;  %v583_v30 = vmax.f32 %v576_v22, %v582_v28  ;;  %v892_v50 = vperm.slane %v884_v34, 0  ;;  %v893_v51 = vperm.slane %v885_v35, 0 }
 0x192   :  { %v894_v53 = vperm.slane %v886_v36, 0  ;;  %v895_v54 = vperm.slane %v887_v44, 0  ;;  %v896_v55 = vperm.slane %v888_v47, 0  ;;  %v897_v62 = vperm.slane %v889_v15, 0 }
 0x193   :  { %v584_v37 = vmax.f32 %v579_v26, %v581_v29  ;;  %v585_v38 = vmax.f32 %v583_v30, %v577_v33  ;;  %vm2020_vm5 = vcmp.eq.s32.totalorder %v890_v48, 1  ;;  %vm2025_vm7 = vcmp.eq.s32.totalorder %v891_v6, 1  ;;  %v1440_v29 = vld [vmem:[%s3091_s3 + $0x5] sm:$0x1] }
 0x194   :  { %vm2029_vm8 = vcmp.eq.s32.totalorder %v892_v50, 1  ;;  %vm2035_vm9 = vcmp.eq.s32.totalorder %v893_v51, 1  ;;  %vm2039_vm10 = vcmp.eq.s32.totalorder %v894_v53, 1  ;;  %vm2043_vm11 = vcmp.eq.s32.totalorder %v895_v54, 1 }
 0x195   :  { %v2012_v49 = vmax.f32 %v584_v37, %v585_v38  ;;  %vm921_vm3 = vcmp.eq.s32.totalorder %v1973_v17, 1  ;;  %v922_v22 = vsel %vm914_vm6, 1, %v3096_v2  ;;  %v923_v25 = vsel %vm915_vm12, 1, %v3096_v2 }
 0x196   :  { %v924_v27 = vsel %vm916_vm13, 1, %v3096_v2  ;;  %v925_v28 = vsel %vm917_vm14, 1, %v3096_v2  ;;  %vm2062_vm4 = vcmp.eq.s32.totalorder %v896_v55, 1  ;;  %vm2066_vm1 = vcmp.eq.s32.totalorder %v897_v62, 1 }
 0x197   :  { %v587_v56 = vsub.f32 %v567_v8, %v2012_v49  ;;  %v588_v57 = vsub.f32 %v568_v9, %v2012_v49  ;;  %v589_v58 = vsub.f32 %v569_v14, %v2012_v49  ;;  %v590_v59 = vsub.f32 %v570_v19, %v2012_v49 }
 0x198   :  { %v591_v60 = vsub.f32 %v571_v16, %v2012_v49  ;;  %v592_v9 = vsub.f32 %v1976_v40, %v2012_v49  ;;  %v593_v40 = vsub.f32 %v1978_v42, %v2012_v49  ;;  %v926_v30 = vsel %vm918_vm15, 1, %v3096_v2 }
 0x199   :  { %v594_v0 = vmul.f32 1.442695, %v587_v56  ;;  %v596_v1 = vmul.f32 1.442695, %v588_v57  ;;  %v598_v4 = vmul.f32 1.442695, %v589_v58 }
 0x19a   :  { %v600_v14 = vmul.f32 1.442695, %v590_v59  ;;  %v602_v21 = vmul.f32 1.442695, %v591_v60  ;;  %v604_v26 = vmul.f32 1.442695, %v592_v9 }
 0x19b   :  { %1553 = vpow2.f32 %v594_v0  ;;  %v927_v31 = vsel %vm919_vm0, 1, %v3096_v2  ;;  %v606_v32 = vmul.f32 1.442695, %v593_v40  ;;  %v928_v33 = vsel %vm920_vm2, 1, %v3096_v2 }
 0x19c   :  { %1555 = vpow2.f32 %v596_v1  ;;  %v929_v34 = vsel %vm921_vm3, 1, %v3096_v2  ;;  %v930_v36 = vperm.slane %v922_v22, 0  ;;  %v931_v37 = vperm.slane %v923_v25, 0 }
 0x19d   :  { %1557 = vpow2.f32 %v598_v4  ;;  %v932_v38 = vperm.slane %v924_v27, 0  ;;  %v933_v44 = vperm.slane %v925_v28, 0  ;;  %vm3115_vm6 = vcmask 1046528  }
 0x19e   :  { %1559 = vpow2.f32 %v600_v14  ;;  %v934_v15 = vperm.slane %v926_v30, 0  ;;  %v935_v6 = vperm.slane %v927_v31, 0  ;;  %vm3116_vm12 = vmmov %vm3115_vm6  ;;  %v906_v53 = vsel %vm2020_vm5, %v1711_v13, 0.0 }
 0x19f   :  { %1561 = vpow2.f32 %v602_v21  ;;  %v936_v54 = vperm.slane %v928_v33, 0  ;;  %v937_v55 = vperm.slane %v929_v34, 0  ;;  %v907_v58 = vsel %vm2025_vm7, %v1711_v13, 0.0  ;;  %vm3117_vm13 = vmmov %vm3115_vm6 }
 0x1a0   :  { %1563 = vpow2.f32 %v604_v26  ;;  %v908_v59 = vsel %vm2029_vm8, %v1711_v13, 0.0  ;;  %v909_v62 = vsel %vm2035_vm9, %v1711_v13, 0.0  ;;  %v910_v63 = vsel %vm2039_vm10, %v1711_v13, 0.0  ;;  %vm3120_vm7 = vmmov %vm3115_vm6 }
 0x1a1   :  { %v1554_v35 = vpop.eup %1553  ;;  %1565 = vpow2.f32 %v606_v32  ;;  %v911_v0 = vsel %vm2043_vm11, %v1711_v13, 0.0  ;;  %v912_v7 = vsel %vm2062_vm4, %v1711_v13, 0.0  ;;  %v913_v8 = vsel %vm2066_vm1, %v1711_v13, 0.0  ;;  %vm3129_vm15 = vmmov %vm3115_vm6 }
 0x1a2   :  { %v1556_v47 = vpop.eup %1555  ;;  %v608_v48 = vsel %vm3115_vm6, %v1554_v35, 0.0  ;;  %vm2105_vm5 = vcmp.eq.s32.totalorder %v930_v36, 1  ;;  %vm2110_vm8 = vcmp.eq.s32.totalorder %v931_v37, 1  ;;  %vm2114_vm9 = vcmp.eq.s32.totalorder %v932_v38, 1 }
 0x1a3   :  { %v1558_v50 = vpop.eup %1557  ;;  %v609_v51 = vsel %vm3116_vm12, %v1556_v47, 0.0  ;;  %vm2118_vm10 = vcmp.eq.s32.totalorder %v933_v44, 1  ;;  %vm2122_vm1 = vcmp.eq.s32.totalorder %v934_v15, 1  ;;  %vm954_vm11 = vcmp.eq.s32.totalorder %v1913_v39, 2 }
 0x1a4   :  { %v1560_v56 = vpop.eup %1559  ;;  %v610_v57 = vadd.f32 %v609_v51, %v608_v48  ;;  %v611_v60 = vsel %vm3117_vm13, %v1558_v50, 0.0  ;;  %vm955_vm14 = vcmp.eq.s32.totalorder %v1918_v43, 2  ;;  %vm2129_vm0 = vcmp.eq.s32.totalorder %v935_v6, 1  ;;  %vm3134_vm13 = vmmov %vm3120_vm7 }
 0x1a5   :  { %v1562_v1 = vpop.eup %1561  ;;  %v613_v14 = vsel %vm3120_vm7, %v1560_v56, 0.0  ;;  %v3130_v26 = vmov 0  ;;  %vm956_vm2 = vcmp.eq.s32.totalorder %v1923_v45, 2  ;;  %vm957_vm3 = vcmp.eq.s32.totalorder %v1937_v5, 2 }
 0x1a6   :  { %v612_v4 = vadd.f32 %v611_v60, %v610_v57  ;;  %v1564_v40 = vpop.eup %1563  ;;  %v615_v25 = vsel %vm3129_vm15, %v1562_v1, 0.0  ;;  %v3131_v26 = vsel %vm2129_vm0, 4294967295, %v3130_v26  ;;  %vm2135_vm4 = vcmp.eq.s32.totalorder %v936_v54, 1 }
 0x1a7   :  { %v1566_v27 = vpop.eup %1565  ;;  %v3132_v42 = vmov 0  ;;  %vm958_vm6 = vcmp.eq.s32.totalorder %v1945_v52, 2  ;;  %vm959_vm12 = vcmp.eq.s32.totalorder %v1955_v61, 2  ;;  %v617_v30 = vsel %vm3134_vm13, %v1564_v40, 0.0 }
 0x1a8   :  { %v614_v21 = vadd.f32 %v613_v14, %v612_v4  ;;  %v3133_v42 = vsel %vm2135_vm4, 4294967295, %v3132_v42  ;;  %vm2145_vm7 = vcmp.eq.s32.totalorder %v937_v55, 1  ;;  %v962_v32 = vsel %vm954_vm11, 1, %v3096_v2  ;;  %vm3137_vm4 = vmmov %vm3134_vm13 }
 0x1a9   :  { %v963_v33 = vsel %vm955_vm14, 1, %v3096_v2  ;;  %vm960_vm15 = vcmp.eq.s32.totalorder %v1965_v3, 2  ;;  %v964_v35 = vsel %vm956_vm2, 1, %v3096_v2  ;;  %v965_v36 = vsel %vm957_vm3, 1, %v3096_v2 }
 0x1aa   :  { %v616_v28 = vadd.f32 %v615_v25, %v614_v21  ;;  %v619_v37 = vsel %vm3137_vm4, %v1566_v27, 0.0  ;;  %vm961_vm0 = vcmp.eq.s32.totalorder %v1973_v17, 2  ;;  %v966_v38 = vsel %vm958_vm6, 1, %v3096_v2 }
 0x1ab   :  { %v967_v44 = vsel %vm959_vm12, 1, %v3096_v2  ;;  %vm538_vm13 = vcmp.ne.f32.partialorder %v1440_v29, 0.0  ;;  %v970_v48 = vperm.slane %v962_v32, 0  ;;  %v971_v15 = vperm.slane %v963_v33, 0 }
 0x1ac   :  { %v618_v34 = vadd.f32 %v617_v30, %v616_v28  ;;  %v2161_v6 = vsel %vm2105_vm5, %v1725_v24, %v906_v53  ;;  %v2166_v50 = vsel %vm2110_vm8, %v1725_v24, %v907_v58  ;;  %v972_v51 = vperm.slane %v964_v35, 0 }
 0x1ad   :  { %v973_v54 = vperm.slane %v965_v36, 0  ;;  %v2171_v55 = vsel %vm2114_vm9, %v1725_v24, %v908_v59  ;;  %v2176_v56 = vsel %vm2118_vm10, %v1725_v24, %v909_v62  ;;  %v974_v53 = vperm.slane %v966_v38, 0 }
 0x1ae   :  { %v620_v47 = vadd.f32 %v619_v37, %v618_v34  ;;  %v624_v57 = vsel %vm538_vm13, 1, %v3096_v2  ;;  %v968_v58 = vsel %vm960_vm15, 1, %v3096_v2  ;;  %v969_v60 = vsel %vm961_vm0, 1, %v3096_v2 }
 0x1af   :  { %v975_v1 = vperm.slane %v967_v44, 0  ;;  %v2188_v59 = vsel %vm2122_vm1, %v1725_v24, %v910_v63  ;;  %vm3138_vm5 = vnez %v3131_v26  ;;  %vm2195_vm8 = vcmp.eq.s32.totalorder %v970_v48, 1 }
 0x1b0   :  { %1567 = vlog2.f32 %v620_v47  ;;  %v2193_v62 = vsel %vm3138_vm5, %v1725_v24, %v911_v0  ;;  %vm2199_vm9 = vcmp.eq.s32.totalorder %v971_v15, 1  ;;  %vm3143_vm10 = vnez %v3133_v42 }
 0x1b1   :  { %v2206_v14 = vsel %vm3143_vm10, %v1725_v24, %v912_v7  ;;  %v2211_v63 = vsel %vm2145_vm7, %v1725_v24, %v913_v8  ;;  %vm2213_vm1 = vcmp.eq.s32.totalorder %v972_v51, 1  ;;  %vm2217_vm11 = vcmp.eq.s32.totalorder %v973_v54, 1 }
 0x1b2   :  { %v625_v19 = vperm.slane %v624_v57, 0  ;;  %v976_v20 = vperm.slane %v968_v58, 0  ;;  %v977_v40 = vperm.slane %v969_v60, 0  ;;  %vm2221_vm14 = vcmp.eq.s32.totalorder %v974_v53, 1 }
 0x1b3   :  { %vm2225_vm0 = vcmp.eq.s32.totalorder %v975_v1, 1  ;;  %v3150_v7 = vmov 0  ;;  %v986_v8 = vsel %vm2195_vm8, %v1709_v12, %v2161_v6  ;;  %vm994_vm2 = vcmp.eq.s32.totalorder %v1913_v39, 3  ;;  %v1441_v1 = vld [vmem:[%s3088_s0 + $0x30] sm:$0x7f] }
 0x1b4   :  { %v3151_v7 = vsel %vm2225_vm0, 4294967295, %v3150_v7  ;;  %vm995_vm3 = vcmp.eq.s32.totalorder %v1918_v43, 3  ;;  %vm996_vm4 = vcmp.eq.s32.totalorder %v1923_v45, 3  ;;  %vm997_vm6 = vcmp.eq.s32.totalorder %v1937_v5, 3 }
 0x1b5   :  { %vm998_vm12 = vcmp.eq.s32.totalorder %v1945_v52, 3  ;;  %vm999_vm7 = vcmp.eq.s32.totalorder %v1955_v61, 3  ;;  %vm626_vm15 = vcmp.eq.s32.totalorder %v625_v19, 1  ;;  %vm1000_vm13 = vcmp.eq.s32.totalorder %v1965_v3, 3 }
 0x1b6   :  { %v1568_v25 = vpop.eup %1567  ;;  %vm1001_vm5 = vcmp.eq.s32.totalorder %v1973_v17, 3  ;;  %v1002_v42 = vsel %vm994_vm2, 1, %v3096_v2  ;;  %v1003_v32 = vsel %vm995_vm3, 1, %v3096_v2  ;;  %v1004_v33 = vsel %vm996_vm4, 1, %v3096_v2 }
 0x1b7   :  { %v622_v28 = vmul.f32 0.6931472, %v1568_v25  ;;  %v1005_v34 = vsel %vm997_vm6, 1, %v3096_v2  ;;  %v1006_v35 = vsel %vm998_vm12, 1, %v3096_v2  ;;  %v2272_v37 = vsel %vm1000_vm13, 1, %v3096_v2 }
 0x1b8   :  { %v2275_v38 = vsel %vm1001_vm5, 1, %v3096_v2  ;;  %v1010_v44 = vperm.slane %v1002_v42, 0  ;;  %vm2281_vm10 = vcmp.eq.s32.totalorder %v976_v20, 1  ;;  %vm2288_vm2 = vcmp.eq.s32.totalorder %v977_v40, 1 }
 0x1b9   :  { %v623_v29 = vadd.f32 %v622_v28, %v2012_v49  ;;  %v1007_v49 = vsel %vm999_vm7, 1, %v3096_v2  ;;  %v1011_v60 = vperm.slane %v1003_v32, 0  ;;  %v1012_v30 = vperm.slane %v1004_v33, 0 }
 0x1ba   :  { %vm3156_vm3 = vcmask 1046528   ;;  %vm1018_vm13 = vcmp.eq.s32.totalorder %v1010_v44, 1  ;;  %v993_v44 = vsel %vm2288_vm2, %v1709_v12, %v2211_v63  ;;  %v3168_v63 = vsel %vm2199_vm9, %v1709_v12, %v2166_v50 }
 0x1bb   :  { %v2269_v36 = vsel %vm626_vm15, %v623_v29, %v1926_v46  ;;  %vm3157_vm4 = vmmov %vm3156_vm3  ;;  %vm1019_vm5 = vcmp.eq.s32.totalorder %v1011_v60, 1  ;;  %vm1020_vm0 = vcmp.eq.s32.totalorder %v1012_v30, 1  ;;  %v3169_v58 = vsel %vm2213_vm1, %v1709_v12, %v2171_v55 }
 0x1bc   :  { %v634_v47 = vrot.slane %v2269_v36, 1  ;;  %v635_v48 = vrot.slane %v2269_v36, 2  ;;  %v636_v15 = vrot.slane %v2269_v36, 3  ;;  %v637_v51 = vrot.slane %v2269_v36, 4  ;;  %vm3158_vm6 = vmmov %vm3156_vm3 }
 0x1bd   :  { %v638_v46 = vrot.slane %v2269_v36, 5  ;;  %v639_v53 = vrot.slane %v2269_v36, 6  ;;  %v640_v57 = vperm.slane %v2269_v36, 0  ;;  %vm3159_vm12 = vmmov %vm3156_vm3  ;;  %v2362_v4 = vsel %vm1020_vm0, %v1739_v41, %v3169_v58 }
 0x1be   :  { %v641_v19 = vperm.slane %v634_v47, 0  ;;  %v642_v20 = vperm.slane %v635_v48, 0  ;;  %v643_v25 = vperm.slane %v636_v15, 0  ;;  %v644_v28 = vperm.slane %v637_v51, 0  ;;  %vm3160_vm7 = vmmov %vm3156_vm3 }
 0x1bf   :  { %v645_v42 = vperm.slane %v638_v46, 0  ;;  %v646_v29 = vperm.slane %v639_v53, 0  ;;  %v654_v31 = vadd.f32 %v640_v57, %v1711_v13  ;;  %v1013_v15 = vperm.slane %v1005_v34, 0  ;;  %vm3161_vm15 = vmmov %vm3156_vm3 }
 0x1c0   :  { %v655_v27 = vadd.f32 %v641_v19, %v1725_v24  ;;  %v656_v40 = vadd.f32 %v642_v20, %v1709_v12  ;;  %v657_v2 = vadd.f32 %v643_v25, %v1739_v41  ;;  %v658_v32 = vadd.f32 %v644_v28, %v1723_v23 }
 0x1c1   :  { %v659_v26 = vadd.f32 %v645_v42, %v1704_v10  ;;  %v660_v47 = vadd.f32 %v646_v29, %v1717_v18  ;;  %v661_v48 = vadd.f32 %v1441_v1, %v654_v31  ;;  %v1014_v57 = vperm.slane %v1006_v35, 0 }
 0x1c2   :  { %v662_v51 = vadd.f32 %v1441_v1, %v655_v27  ;;  %v663_v46 = vadd.f32 %v1441_v1, %v656_v40  ;;  %v2302_v53 = vadd.f32 %v1441_v1, %v658_v32  ;;  %v664_v33 = vadd.f32 %v1441_v1, %v657_v2 }
 0x1c3   :  { %v2304_v22 = vadd.f32 %v1441_v1, %v659_v26  ;;  %v2306_v19 = vadd.f32 %v1441_v1, %v660_v47  ;;  %v1015_v20 = vperm.slane %v1007_v49, 0  ;;  %v668_v25 = vsel %vm3156_vm3, %v661_v48, -inf }
 0x1c4   :  { %v669_v28 = vsel %vm3157_vm4, %v662_v51, -inf  ;;  %v670_v42 = vsel %vm3158_vm6, %v663_v46, -inf  ;;  %v672_v31 = vsel %vm3159_vm12, %v2302_v53, -inf  ;;  %v671_v49 = vsel %vm3156_vm3, %v664_v33, -inf }
 0x1c5   :  { %v673_v27 = vmax.f32 %v668_v25, %v672_v31  ;;  %v674_v34 = vsel %vm3160_vm7, %v2304_v22, -inf  ;;  %v676_v2 = vsel %vm3161_vm15, %v2306_v19, -inf  ;;  %v992_v1 = vsel %vm2281_vm10, %v1709_v12, %v2206_v14 }
 0x1c6   :  { %v675_v26 = vmax.f32 %v669_v28, %v674_v34  ;;  %v677_v35 = vmax.f32 %v670_v42, %v676_v2  ;;  %v1016_v29 = vperm.slane %v2272_v37, 0  ;;  %v1017_v40 = vperm.slane %v2275_v38, 0 }
 0x1c7   :  { %vm2328_vm4 = vcmp.eq.s32.totalorder %v1013_v15, 1  ;;  %vm2332_vm6 = vcmp.eq.s32.totalorder %v1014_v57, 1  ;;  %vm2336_vm12 = vcmp.eq.s32.totalorder %v1015_v20, 1  ;;  %v2346_v37 = vsel %vm1018_vm13, %v1739_v41, %v986_v8 }
 0x1c8   :  { %v678_v32 = vmax.f32 %v673_v27, %v675_v26  ;;  %v679_v47 = vmax.f32 %v677_v35, %v671_v49  ;;  %v2354_v38 = vsel %vm1019_vm5, %v1739_v41, %v3168_v63  ;;  %vm1034_vm8 = vcmp.eq.s32.totalorder %v1913_v39, 4 }
 0x1c9   :  { %vm1035_vm2 = vcmp.eq.s32.totalorder %v1918_v43, 4  ;;  %vm1036_vm7 = vcmp.eq.s32.totalorder %v1923_v45, 4  ;;  %vm2369_vm9 = vcmp.eq.s32.totalorder %v1016_v29, 1  ;;  %vm2373_vm15 = vcmp.eq.s32.totalorder %v1017_v40, 1 }
 0x1ca   :  { %v2364_v6 = vmax.f32 %v678_v32, %v679_v47  ;;  %vm1037_vm1 = vcmp.eq.s32.totalorder %v1937_v5, 4  ;;  %vm1038_vm0 = vcmp.eq.s32.totalorder %v1945_v52, 4  ;;  %vm1039_vm13 = vcmp.eq.s32.totalorder %v1955_v61, 4 }
 0x1cb   :  { %vm1040_vm5 = vcmp.eq.s32.totalorder %v1965_v3, 4  ;;  %vm1041_vm3 = vcmp.eq.s32.totalorder %v1973_v17, 4  ;;  %v3174_v20 = vmov 0   ;;  %v3176_v58 = vsel %vm2221_vm14, %v1709_v12, %v2188_v59 }
 0x1cc   :  { %v681_v55 = vsub.f32 %v661_v48, %v2364_v6  ;;  %v682_v0 = vsub.f32 %v662_v51, %v2364_v6  ;;  %v683_v8 = vsub.f32 %v663_v46, %v2364_v6  ;;  %v684_v15 = vsub.f32 %v664_v33, %v2364_v6 }
 0x1cd   :  { %v685_v57 = vsub.f32 %v2302_v53, %v2364_v6  ;;  %v1042_v28 = vsel %vm1034_vm8, 1, %v3174_v20  ;;  %v1043_v42 = vsel %vm1035_vm2, 1, %v3174_v20  ;;  %v3175_v48 = vsel %vm2217_vm11, %v1709_v12, %v2176_v56 }
 0x1ce   :  { %v688_v31 = vmul.f32 1.442695, %v681_v55  ;;  %v690_v27 = vmul.f32 1.442695, %v682_v0  ;;  %v692_v34 = vmul.f32 1.442695, %v683_v8  ;;  %v2398_v51 = vsel %vm2328_vm4, %v1739_v41, %v3175_v48 }
 0x1cf   :  { %v686_v46 = vsub.f32 %v2304_v22, %v2364_v6  ;;  %v694_v53 = vmul.f32 1.442695, %v684_v15  ;;  %v1044_v33 = vsel %vm1036_vm7, 1, %v3174_v20  ;;  %v1045_v16 = vsel %vm1037_vm1, 1, %v3174_v20 }
 0x1d0   :  { %1569 = vpow2.f32 %v688_v31  ;;  %v1046_v56 = vsel %vm1038_vm0, 1, %v3174_v20  ;;  %v1047_v2 = vsel %vm1039_vm13, 1, %v3174_v20  ;;  %v1048_v22 = vsel %vm1040_vm5, 1, %v3174_v20 }
 0x1d1   :  { %v687_v26 = vsub.f32 %v2306_v19, %v2364_v6  ;;  %1571 = vpow2.f32 %v690_v27  ;;  %v696_v35 = vmul.f32 1.442695, %v685_v57  ;;  %v1050_v49 = vperm.slane %v1042_v28, 0 }
 0x1d2   :  { %1573 = vpow2.f32 %v692_v34  ;;  %v1049_v29 = vsel %vm1041_vm3, 1, %v3174_v20  ;;  %v1051_v40 = vperm.slane %v1043_v42, 0  ;;  %v1052_v32 = vperm.slane %v1044_v33, 0 }
 0x1d3   :  { %1575 = vpow2.f32 %v694_v53  ;;  %v698_v47 = vmul.f32 1.442695, %v686_v46  ;;  %v1053_v30 = vperm.slane %v1045_v16, 0  ;;  %v1054_v63 = vperm.slane %v1046_v56, 0 }
 0x1d4   :  { %v2430_v19 = vsel %vm2332_vm6, %v1739_v41, %v3176_v58  ;;  %vm3177_vm11 = vnez %v3151_v7  ;;  %v1055_v8 = vperm.slane %v1047_v2, 0  ;;  %v1056_v21 = vperm.slane %v1048_v22, 0 }
 0x1d5   :  { %v3178_v55 = vsel %vm3177_vm11, %v1709_v12, %v2193_v62  ;;  %1577 = vpow2.f32 %v696_v35  ;;  %v700_v15 = vmul.f32 1.442695, %v687_v26  ;;  %v1057_v59 = vperm.slane %v1049_v29, 0 }
 0x1d6   :  { %v2440_v0 = vsel %vm2336_vm12, %v1739_v41, %v3178_v55  ;;  %vm2442_vm14 = vcmp.eq.s32.totalorder %v1050_v49, 1  ;;  %v1570_v60 = vpop.eup %1569  ;;  %v2454_v62 = vsel %vm2369_vm9, %v1739_v41, %v992_v1  ;;  %v2459_v7 = vsel %vm2373_vm15, %v1739_v41, %v993_v44 }
 0x1d7   :  { %vm2461_vm4 = vcmp.eq.s32.totalorder %v1051_v40, 1  ;;  %vm2465_vm6 = vcmp.eq.s32.totalorder %v1052_v32, 1  ;;  %v1572_v54 = vpop.eup %1571  ;;  %1579 = vpow2.f32 %v698_v47  ;;  %vm3185_vm10 = vcmask 1046528  }
 0x1d8   :  { %v702_v14 = vsel %vm3185_vm10, %v1570_v60, 0.0  ;;  %vm2470_vm12 = vcmp.eq.s32.totalorder %v1053_v30, 1  ;;  %vm2474_vm8 = vcmp.eq.s32.totalorder %v1054_v63, 1  ;;  %v1574_v44 = vpop.eup %1573  ;;  %vm3190_vm2 = vmmov %vm3185_vm10  ;;  %vm2479_vm7 = vcmp.eq.s32.totalorder %v1055_v8, 1 }
 0x1d9   :  { %v703_v9 = vsel %vm3190_vm2, %v1572_v54, 0.0  ;;  %vm2483_vm9 = vcmp.eq.s32.totalorder %v1056_v21, 1  ;;  %v1066_v27 = vsel %vm2442_vm14, %v1723_v23, %v2346_v37  ;;  %v1576_v34 = vpop.eup %1575  ;;  %1581 = vpow2.f32 %v700_v15  ;;  %vm3197_vm0 = vmmov %vm3190_vm2  ;;  %v1442_v21 = vld [vmem:[%s3091_s3 + $0x6] sm:$0x1] }
 0x1da   :  { %v704_v48 = vadd.f32 %v703_v9, %v702_v14  ;;  %vm2491_vm15 = vcmp.eq.s32.totalorder %v1057_v59, 1  ;;  %v1067_v53 = vsel %vm2461_vm4, %v1723_v23, %v2354_v38  ;;  %vm1074_vm1 = vcmp.eq.s32.totalorder %v1913_v39, 5  ;;  %vm3198_vm2 = vmmov %vm3197_vm0 }
 0x1db   :  { %v705_v33 = vsel %vm3197_vm0, %v1574_v44, 0.0  ;;  %vm1075_vm13 = vcmp.eq.s32.totalorder %v1918_v43, 5  ;;  %vm1076_vm5 = vcmp.eq.s32.totalorder %v1923_v45, 5  ;;  %vm1077_vm3 = vcmp.eq.s32.totalorder %v1937_v5, 5  ;;  %v1578_v37 = vpop.eup %1577 }
 0x1dc   :  { %v706_v16 = vadd.f32 %v705_v33, %v704_v48  ;;  %vm1078_vm11 = vcmp.eq.s32.totalorder %v1945_v52, 5  ;;  %vm1079_vm14 = vcmp.eq.s32.totalorder %v1955_v61, 5  ;;  %vm1080_vm10 = vcmp.eq.s32.totalorder %v1965_v3, 5 }
 0x1dd   :  { %v707_v38 = vsel %vm3198_vm2, %v1576_v34, 0.0  ;;  %v1068_v56 = vsel %vm2465_vm6, %v1723_v23, %v2362_v4  ;;  %vm1081_vm4 = vcmp.eq.s32.totalorder %v1973_v17, 5  ;;  %v1082_v2 = vsel %vm1074_vm1, 1, %v3174_v20  ;;  %v1580_v22 = vpop.eup %1579  ;;  %vm3199_vm6 = vmmov %vm3197_vm0 }
 0x1de   :  { %v708_v26 = vadd.f32 %v707_v38, %v706_v16  ;;  %v1083_v35 = vsel %vm1075_vm13, 1, %v3174_v20  ;;  %v1084_v49 = vsel %vm1076_vm5, 1, %v3174_v20  ;;  %v1085_v29 = vsel %vm1077_vm3, 1, %v3174_v20  ;;  %vm3200_vm1 = vmmov %vm3197_vm0 }
 0x1df   :  { %v709_v40 = vsel %vm3197_vm0, %v1578_v37, 0.0  ;;  %v1086_v32 = vsel %vm1078_vm11, 1, %v3174_v20  ;;  %v1087_v47 = vsel %vm1079_vm14, 1, %v3174_v20  ;;  %v1088_v4 = vsel %vm1080_vm10, 1, %v3174_v20  ;;  %v1582_v30 = vpop.eup %1581 }
 0x1e0   :  { %v710_v63 = vadd.f32 %v709_v40, %v708_v26  ;;  %v1069_v58 = vsel %vm2470_vm12, %v1723_v23, %v2398_v51  ;;  %v1089_v55 = vsel %vm1081_vm4, 1, %v3174_v20  ;;  %v1090_v8 = vperm.slane %v1082_v2, 0 }
 0x1e1   :  { %v711_v15 = vsel %vm3199_vm6, %v1580_v22, 0.0  ;;  %v1091_v59 = vperm.slane %v1083_v35, 0  ;;  %v1092_v57 = vperm.slane %v1084_v49, 0  ;;  %v1093_v60 = vperm.slane %v1085_v29, 0  ;;  %v2623_v35 = vld [vmem:[%s3091_s3 + $0x2] sm:$0x1] }
 0x1e2   :  { %v712_v25 = vadd.f32 %v711_v15, %v710_v63  ;;  %v1094_v28 = vperm.slane %v1086_v32, 0  ;;  %v1095_v54 = vperm.slane %v1087_v47, 0  ;;  %v1096_v14 = vperm.slane %v1088_v4, 0  ;;  %v2643_v63 = vld [vmem:[%s3091_s3 + $0x3] sm:$0x1] }
 0x1e3   :  { %v713_v44 = vsel %vm3200_vm1, %v1582_v30, 0.0  ;;  %v1070_v51 = vsel %vm2474_vm8, %v1723_v23, %v2430_v19  ;;  %v1071_v1 = vsel %vm2479_vm7, %v1723_v23, %v2440_v0  ;;  %v1097_v9 = vperm.slane %v1089_v55, 0  ;;  %v1443_v19 = vld [vmem:[%s3088_s0 + $0x38] sm:$0x7f] }
 0x1e4   :  { %vm632_vm12 = vcmp.ne.f32.partialorder %v1442_v21, 0.0  ;;  %v714_v34 = vadd.f32 %v713_v44, %v712_v25  ;;  %v1072_v48 = vsel %vm2483_vm9, %v1723_v23, %v2454_v62  ;;  %vm1098_vm13 = vcmp.eq.s32.totalorder %v1090_v8, 1 }
 0x1e5   :  { %v1073_v50 = vsel %vm2491_vm15, %v1723_v23, %v2459_v7  ;;  %vm1099_vm8 = vcmp.eq.s32.totalorder %v1091_v59, 1  ;;  %vm1100_vm5 = vcmp.eq.s32.totalorder %v1092_v57, 1  ;;  %vm1101_vm3 = vcmp.eq.s32.totalorder %v1093_v60, 1  ;;  %v2655_v59 = vld [vmem:[%s3090_s2] ss:$0 sm:$0xff] }
 0x1e6   :  { %1583 = vlog2.f32 %v714_v34  ;;  %vm2547_vm11 = vcmp.eq.s32.totalorder %v1094_v28, 1  ;;  %vm2551_vm7 = vcmp.eq.s32.totalorder %v1095_v54, 1  ;;  %vm2555_vm14 = vcmp.eq.s32.totalorder %v1096_v14, 1 }
 0x1e7   :  { %v718_v42 = vsel %vm632_vm12, 1, %v3174_v20  ;;  %vm2560_vm9 = vcmp.eq.s32.totalorder %v1097_v9, 1  ;;  %v2565_v31 = vsel %vm1098_vm13, %v1704_v10, %v1066_v27  ;;  %vm1114_vm15 = vcmp.eq.s32.totalorder %v1913_v39, 6 }
 0x1e8   :  { %v2569_v46 = vsel %vm1099_vm8, %v1704_v10, %v1067_v53  ;;  %v2572_v33 = vsel %vm1100_vm5, %v1704_v10, %v1068_v56  ;;  %v2575_v37 = vsel %vm1101_vm3, %v1704_v10, %v1069_v58  ;;  %vm1115_vm10 = vcmp.eq.s32.totalorder %v1918_v43, 6  ;;  %v2588_v53 = vld [vmem:[%s3091_s3] sm:$0x1]  ;;  %v2593_v43 = vld [vmem:[%s3091_s3 + $0x1] sm:$0x1] }
 0x1e9   :  { %vm1116_vm2 = vcmp.eq.s32.totalorder %v1923_v45, 6  ;;  %vm1117_vm4 = vcmp.eq.s32.totalorder %v1937_v5, 6  ;;  %vm1118_vm0 = vcmp.eq.s32.totalorder %v1945_v52, 6  ;;  %vm1119_vm6 = vcmp.eq.s32.totalorder %v1955_v61, 6 }
 0x1ea   :  { %v719_v39 = vperm.slane %v718_v42, 0  ;;  %vm1120_vm1 = vcmp.eq.s32.totalorder %v1965_v3, 6  ;;  %vm1121_vm12 = vcmp.eq.s32.totalorder %v1973_v17, 6  ;;  %v1122_v27 = vsel %vm1114_vm15, 1, %v3174_v20 }
 0x1eb   :  { %v2598_v45 = vsel %vm2547_vm11, %v1704_v10, %v1070_v51  ;;  %v2603_v5 = vsel %vm2551_vm7, %v1704_v10, %v1071_v1  ;;  %v1123_v52 = vsel %vm1115_vm10, 1, %v3174_v20  ;;  %vm1338_vm13 = vcmask 1040384   ;;  %v2674_v51 = vld [vmem:[%s3090_s2 + $0x1] ss:$0 sm:$0xff] }
 0x1ec   :  { %v1584_v61 = vpop.eup %1583  ;;  %v1124_v3 = vsel %vm1116_vm2, 1, %v3174_v20  ;;  %v1125_v17 = vsel %vm1117_vm4, 1, %v3174_v20  ;;  %v2609_v16 = vsel %vm1118_vm0, 1, %v3174_v20  ;;  %v2612_v38 = vsel %vm1119_vm6, 1, %v3174_v20 }
 0x1ed   :  { %v716_v56 = vmul.f32 0.6931472, %v1584_v61  ;;  %v2615_v2 = vsel %vm1120_vm1, 1, %v3174_v20  ;;  %v2618_v22 = vsel %vm1121_vm12, 1, %v3174_v20  ;;  %v1130_v26 = vperm.slane %v1122_v27, 0 }
 0x1ee   :  { %vm720_vm8 = vcmp.eq.s32.totalorder %v719_v39, 1  ;;  %v1131_v49 = vperm.slane %v1123_v52, 0  ;;  %v1354_v29 = vsel %vm1338_vm13, %v2588_v53, 0.0  ;;  %v1355_v40 = vsel %vm1338_vm13, %v2593_v43, 0.0  ;;  %v2692_v61 = vld [vmem:[%s3091_s3 + $0x4] sm:$0x1] }
 0x1ef   :  { %v717_v32 = vadd.f32 %v716_v56, %v2364_v6  ;;  %v2633_v47 = vsel %vm2555_vm14, %v1704_v10, %v1072_v48  ;;  %v2638_v4 = vsel %vm2560_vm9, %v1704_v10, %v1073_v50  ;;  %v1132_v30 = vperm.slane %v1124_v3, 0 }
 0x1f0   :  { %v1133_v58 = vperm.slane %v1125_v17, 0  ;;  %v1134_v55 = vperm.slane %v2609_v16, 0  ;;  %v1135_v6 = vperm.slane %v2612_v38, 0  ;;  %v1136_v8 = vperm.slane %v2615_v2, 0 }
 0x1f1   :  { %v2649_v21 = vsel %vm720_vm8, %v717_v32, %v2269_v36  ;;  %v1137_v15 = vperm.slane %v2618_v22, 0  ;;  %v1356_v57 = vadd.f32 %v1355_v40, %v1354_v29  ;;  %v1357_v60 = vsel %vm1338_vm13, %v2623_v35, 0.0 }
 0x1f2   :  { %v728_v25 = vrot.slane %v2649_v21, 1  ;;  %v729_v28 = vrot.slane %v2649_v21, 2  ;;  %v730_v54 = vrot.slane %v2649_v21, 3  ;;  %v731_v36 = vrot.slane %v2649_v21, 4 }
 0x1f3   :  { %vm2663_vm5 = vcmp.eq.s32.totalorder %v1130_v26, 1  ;;  %vm2667_vm3 = vcmp.eq.s32.totalorder %v1131_v49, 1  ;;  %v732_v1 = vrot.slane %v2649_v21, 5  ;;  %v733_v9 = vrot.slane %v2649_v21, 6 }
 0x1f4   :  { %v734_v34 = vperm.slane %v2649_v21, 0  ;;  %vm2679_vm11 = vcmp.eq.s32.totalorder %v1132_v30, 1  ;;  %v1359_v50 = vsel %vm1338_vm13, %v2643_v63, 0.0  ;;  %v735_v0 = vperm.slane %v728_v25, 0  ;;  %v2724_v25 = vld [vmem:[%s3091_s3 + $0x5] sm:$0x1] }
 0x1f5   :  { %v736_v62 = vperm.slane %v729_v28, 0  ;;  %v737_v42 = vperm.slane %v730_v54, 0  ;;  %v738_v7 = vperm.slane %v731_v36, 0  ;;  %v739_v39 = vperm.slane %v732_v1, 0 }
 0x1f6   :  { %v740_v27 = vperm.slane %v733_v9, 0  ;;  %v748_v52 = vadd.f32 %v734_v34, %v1711_v13  ;;  %v1358_v3 = vadd.f32 %v1357_v60, %v1356_v57  ;;  %v749_v17 = vadd.f32 %v735_v0, %v1725_v24  ;;  %v1459_v9 = vld [vmem:[%s3090_s2 + $0x2] ss:$0 sm:$0xff] }
 0x1f7   :  { %v750_v16 = vadd.f32 %v736_v62, %v1709_v12  ;;  %v751_v38 = vadd.f32 %v737_v42, %v1739_v41  ;;  %v752_v56 = vadd.f32 %v738_v7, %v1723_v23  ;;  %vm1162_vm7 = vcmp.eq.s32.totalorder %v1706_v11, %v2655_v59  ;;  %v1461_v62 = vld [vmem:[%s3090_s2 + $0x4] ss:$0 sm:$0xff]  ;;  %v1462_v7 = vld [vmem:[%s3090_s2 + $0x5] ss:$0 sm:$0xff]  ;;  %v2820_v59 = vld [vmem:[%s3091_s3 + $0x7] sm:$0x1] }
 0x1f8   :  { %vm1163_vm14 = vcmp.eq.s32.totalorder %v1706_v11, %v2674_v51  ;;  %v753_v13 = vadd.f32 %v739_v39, %v1704_v10  ;;  %v754_v2 = vadd.f32 %v740_v27, %v1717_v18  ;;  %v755_v26 = vadd.f32 %v1443_v19, %v748_v52 }
 0x1f9   :  { %vm2704_vm9 = vcmp.eq.s32.totalorder %v1133_v58, 1  ;;  %v756_v12 = vadd.f32 %v1443_v19, %v749_v17  ;;  %v757_v24 = vadd.f32 %v1443_v19, %v750_v16  ;;  %v2708_v41 = vadd.f32 %v1443_v19, %v752_v56 }
 0x1fa   :  { %v1361_v23 = vsel %vm1338_vm13, %v2692_v61, 0.0  ;;  %v758_v29 = vadd.f32 %v1443_v19, %v751_v38  ;;  %v2712_v40 = vadd.f32 %v1443_v19, %v753_v13  ;;  %v2714_v32 = vadd.f32 %v1443_v19, %v754_v2 }
 0x1fb   :  { %v1360_v10 = vadd.f32 %v1359_v50, %v1358_v3  ;;  %vm3217_vm15 = vcmask 1046528   ;;  %vm2730_vm1 = vcmp.eq.s32.totalorder %v1134_v55, 1  ;;  %vm2737_vm12 = vcmp.eq.s32.totalorder %v1135_v6, 1  ;;  %v1460_v55 = vld [vmem:[%s3090_s2 + $0x3] ss:$0 sm:$0xff] }
 0x1fc   :  { %v762_v30 = vsel %vm3217_vm15, %v755_v26, -inf  ;;  %vm3218_vm10 = vmmov %vm3217_vm15  ;;  %vm2741_vm8 = vcmp.eq.s32.totalorder %v1136_v8, 1  ;;  %v1146_v6 = vsel %vm2663_vm5, %v1717_v18, %v2565_v31  ;;  %v1147_v8 = vsel %vm2667_vm3, %v1717_v18, %v2569_v46 }
 0x1fd   :  { %v763_v58 = vsel %vm3218_vm10, %v756_v12, -inf  ;;  %vm3219_vm2 = vmmov %vm3218_vm10  ;;  %v1362_v39 = vadd.f32 %v1361_v23, %v1360_v10  ;;  %v1148_v3 = vsel %vm2679_vm11, %v1717_v18, %v2572_v33  ;;  %v1363_v31 = vsel %vm1338_vm13, %v2724_v25, 0.0 }
 0x1fe   :  { %v764_v57 = vsel %vm3219_vm2, %v757_v24, -inf  ;;  %vm3220_vm4 = vmmov %vm3219_vm2  ;;  %vm2771_vm5 = vcmp.eq.s32.totalorder %v1137_v15, 1  ;;  %v1149_v46 = vsel %vm2704_vm9, %v1717_v18, %v2575_v37  ;;  %v1150_v44 = vsel %vm2730_vm1, %v1717_v18, %v2598_v45  ;;  %v2796_v37 = vld [vmem:[%s3091_s3 + $0x6] sm:$0x1] }
 0x1ff   :  { %v766_v60 = vsel %vm3220_vm4, %v2708_v41, -inf  ;;  %vm3221_vm0 = vmmov %vm3219_vm2  ;;  %v1151_v33 = vsel %vm2737_vm12, %v1717_v18, %v2603_v5  ;;  %v1152_v22 = vsel %vm2741_vm8, %v1717_v18, %v2633_v47  ;;  %v1463_v45 = vld [vmem:[%s3090_s2 + $0x6] ss:$0 sm:$0xff]  ;;  %vm1164_vm3 = vcmp.eq.s32.totalorder %v1706_v11, %v1459_v9 }
 0x200   :  { %v767_v28 = vmax.f32 %v762_v30, %v766_v60  ;;  %v768_v54 = vsel %vm3221_vm0, %v2712_v40, -inf  ;;  %vm3222_vm6 = vmmov %vm3221_vm0  ;;  %vm1165_vm11 = vcmp.eq.s32.totalorder %v1706_v11, %v1460_v55  ;;  %vm1166_vm9 = vcmp.eq.s32.totalorder %v1706_v11, %v1461_v62  ;;  %v1464_v30 = vld [vmem:[%s3090_s2 + $0x7] ss:$0 sm:$0xff] }
 0x201   :  { %v770_v36 = vsel %vm3222_vm6, %v2714_v32, -inf  ;;  %v769_v34 = vmax.f32 %v763_v58, %v768_v54  ;;  %vm3229_vm15 = vmmov %vm3221_vm0  ;;  %vm1167_vm10 = vcmp.eq.s32.totalorder %v1706_v11, %v1462_v7  ;;  %v1170_v5 = vsel %vm1162_vm7, %v1146_v6, 0.0  ;;  %v1465_v54 = vld [vmem:[%s3089_s1] ss:$0 sm:$0xff] }
 0x202   :  { %v771_v50 = vmax.f32 %v764_v57, %v770_v36  ;;  %v765_v42 = vsel %vm3229_vm15, %v758_v29, -inf  ;;  %v1171_v47 = vsel %vm1163_vm14, %v1147_v8, 0.0  ;;  %v1364_v48 = vadd.f32 %v1363_v31, %v1362_v39  ;;  %vm3232_vm14 = vmmov %vm3221_vm0  ;;  %v1250_v7 = vld [vmem:[%s3088_s0] sm:$0x7f] }
 0x203   :  { %v772_v27 = vmax.f32 %v767_v28, %v769_v34  ;;  %v1172_v2 = vsel %vm1164_vm3, %v1148_v3, 0.0  ;;  %v1173_v51 = vsel %vm1165_vm11, %v1149_v46, 0.0  ;;  %v1365_v49 = vsel %vm1338_vm13, %v2796_v37, 0.0  ;;  %vm3233_vm2 = vmmov %vm3221_vm0 }
 0x204   :  { %v773_v52 = vmax.f32 %v771_v50, %v765_v42  ;;  %vm1168_vm7 = vcmp.eq.s32.totalorder %v1706_v11, %v1463_v45  ;;  %v1178_v10 = vsel %vm3232_vm14, %v1170_v5, 0.0  ;;  %v1185_v58 = vsel %vm3233_vm2, %v1171_v47, 0.0  ;;  %vm3234_vm4 = vmmov %vm3221_vm0 }
 0x205   :  { %v1192_v57 = vsel %vm3234_vm4, %v1172_v2, 0.0  ;;  %v1366_v60 = vadd.f32 %v1365_v49, %v1364_v48  ;;  %v1367_v36 = vsel %vm1338_vm13, %v2820_v59, 0.0  ;;  %v1175_v1 = vsel %vm1167_vm10, %v1151_v33, 0.0  ;;  %vm3235_vm12 = vmmov %vm3221_vm0 }
 0x206   :  { %v2791_v15 = vmax.f32 %v772_v27, %v773_v52  ;;  %v1179_v9 = vrot.slane %v1178_v10, 4  ;;  %v1199_v34 = vsel %vm3221_vm0, %v1173_v51, 0.0  ;;  %v1186_v19 = vrot.slane %v1185_v58, 4  ;;  %vm3236_vm8 = vmmov %vm3221_vm0  ;;  %v1468_v51 = vld [vmem:[%s3089_s1 + $0x3] ss:$0 sm:$0xff] }
 0x207   :  { %v1193_v0 = vrot.slane %v1192_v57, 4  ;;  %v1153_v55 = vsel %vm2771_vm5, %v1717_v18, %v2638_v4  ;;  %vm1169_vm6 = vcmp.eq.s32.totalorder %v1706_v11, %v1464_v30  ;;  %v1176_v62 = vsel %vm1168_vm7, %v1152_v22, 0.0  ;;  %v1251_v4 = vld [vmem:[%s3088_s0 + $0x8] sm:$0x7f]  ;;  %vm3237_vm5 = vmmov %vm3221_vm0  ;;  %v1467_v22 = vld [vmem:[%s3089_s1 + $0x2] ss:$0 sm:$0xff] }
 0x208   :  { %v775_v17 = vsub.f32 %v755_v26, %v2791_v15  ;;  %v776_v16 = vsub.f32 %v756_v12, %v2791_v15  ;;  %v777_v38 = vsub.f32 %v757_v24, %v2791_v15  ;;  %v778_v56 = vsub.f32 %v758_v29, %v2791_v15  ;;  %vm3238_vm3 = vmmov %vm3221_vm0 }
 0x209   :  { %v779_v13 = vsub.f32 %v2708_v41, %v2791_v15  ;;  %v780_v24 = vsub.f32 %v2712_v40, %v2791_v15  ;;  %v1174_v41 = vsel %vm1166_vm9, %v1150_v44, 0.0  ;;  %v781_v28 = vsub.f32 %v2714_v32, %v2791_v15  ;;  %v1466_v32 = vld [vmem:[%s3089_s1 + $0x1] ss:$0 sm:$0xff]  ;;  %vm3239_vm9 = vmmov %vm3221_vm0 }
 0x20a   :  { %v782_v26 = vmul.f32 1.442695, %v775_v17  ;;  %v784_v23 = vmul.f32 1.442695, %v776_v16  ;;  %v786_v12 = vmul.f32 1.442695, %v777_v38  ;;  %v1368_v42 = vadd.f32 %v1367_v36, %v1366_v60  ;;  %vm3240_vm10 = vmmov %vm3221_vm0 }
 0x20b   :  { %v788_v29 = vmul.f32 1.442695, %v778_v56  ;;  %v790_v40 = vmul.f32 1.442695, %v779_v13  ;;  %v792_v50 = vmul.f32 1.442695, %v780_v24  ;;  %vm1242_vm1 = vcmp.eq.s32.totalorder %v1706_v11, %v1465_v54  ;;  %vm3241_vm7 = vmmov %vm3221_vm0 }
 0x20c   :  { %1585 = vpow2.f32 %v782_v26  ;;  %v794_v6 = vmul.f32 1.442695, %v781_v28  ;;  %v1200_v8 = vrot.slane %v1199_v34, 4  ;;  %v1180_v27 = vadd.f32 %v1179_v9, %v1178_v10  ;;  %vm3242_vm14 = vmmov %vm3221_vm0  ;;  %v1252_v10 = vld [vmem:[%s3088_s0 + $0x10] sm:$0x7f] }
 0x20d   :  { %1587 = vpow2.f32 %v784_v23  ;;  %v1206_v52 = vsel %vm3235_vm12, %v1174_v41, 0.0  ;;  %v1213_v18 = vsel %vm3236_vm8, %v1175_v1, 0.0  ;;  %vm1243_vm15 = vcmp.eq.s32.totalorder %v1706_v11, %v1466_v32  ;;  %v1469_v41 = vld [vmem:[%s3089_s1 + $0x4] ss:$0 sm:$0xff]  ;;  %vm3243_vm4 = vmmov %vm3221_vm0  ;;  %v1470_v36 = vld [vmem:[%s3089_s1 + $0x5] ss:$0 sm:$0xff] }
 0x20e   :  { %1589 = vpow2.f32 %v786_v12  ;;  %v2866_v14 = vadd.f32 %v1186_v19, %v1185_v58  ;;  %v2868_v46 = vadd.f32 %v1193_v0, %v1192_v57  ;;  %v1258_v45 = vsel %vm1242_vm1, %v1250_v7, 0.0  ;;  %v1253_v19 = vld [vmem:[%s3088_s0 + $0x18] sm:$0x7f]  ;;  %vm3244_vm1 = vmmov %vm3221_vm0 }
 0x20f   :  { %1591 = vpow2.f32 %v788_v29  ;;  %v1447_v5 = vceil.f32 %v1368_v42  ;;  %v1448_v47 = vfloor.f32 %v1368_v42  ;;  %v1259_v16 = vsel %vm1243_vm15, %v1251_v4, 0.0  ;;  %vm3245_vm15 = vmmov %vm3221_vm0 }
 0x210   :  { %1593 = vpow2.f32 %v790_v40  ;;  %vm1446_vm11 = vcmp.lt.s32.totalorder %v1368_v42, 0  ;;  %v2881_v56 = vsel %vm1169_vm6, %v1153_v55, 0.0  ;;  %v1201_v13 = vadd.f32 %v1200_v8, %v1199_v34  ;;  %v1444_v42 = vld [vmem:[%s3091_s3 + $0x7] sm:$0x1]  ;;  %s1422_s3 = sshll.u32 %s3094_s6, 4  ;;  %s1423_s3 = int_to_ptr.hbm [resolvable:$true] %s1422_s3 }
 0x211   :  { %1595 = vpow2.f32 %v792_v50  ;;  %v1207_v2 = vrot.slane %v1206_v52, 4  ;;  %v1214_v23 = vrot.slane %v1213_v18, 4  ;;  %v2887_v12 = vsel %vm3240_vm10, %v1176_v62, 0.0  ;;  %vm3248_vm10 = vmmov %vm3221_vm0 }
 0x212   :  { %v1586_v39 = vpop.eup %1585  ;;  %1597 = vpow2.f32 %v794_v6  ;;  %v1266_v24 = vsel %vm3241_vm7, %v1258_v45, 0.0  ;;  %vm1244_vm2 = vcmp.eq.s32.totalorder %v1706_v11, %v1467_v22  ;;  %v1273_v30 = vsel %vm3243_vm4, %v1259_v16, 0.0  ;;  %v1255_v45 = vld [vmem:[%s3088_s0 + $0x28] sm:$0x7f] }
 0x213   :  { %v1588_v3 = vpop.eup %1587  ;;  %v796_v31 = vsel %vm3237_vm5, %v1586_v39, 0.0  ;;  %v1449_v58 = vsel %vm1446_vm11, %v1447_v5, %v1448_v47  ;;  %v1181_v28 = vrot.slane %v1180_v27, 2  ;;  %v1188_v40 = vrot.slane %v2866_v14, 2  ;;  %vm3246_vm5 = vmmov %vm3221_vm0 }
 0x214   :  { %v1590_v44 = vpop.eup %1589  ;;  %v797_v33 = vsel %vm3238_vm3, %v1588_v3, 0.0  ;;  %v1195_v54 = vrot.slane %v2868_v46, 2  ;;  %v2906_v9 = vadd.f32 %v1207_v2, %v1206_v52  ;;  %vm1245_vm6 = vcmp.eq.s32.totalorder %v1706_v11, %v1468_v51  ;;  %v2926_v3 = vld [vmem:[%s3089_s1 + $0x6] ss:$0 sm:$0xff] }
 0x215   :  { %v1592_v48 = vpop.eup %1591  ;;  %v798_v17 = vadd.f32 %v797_v33, %v796_v31  ;;  %v799_v38 = vsel %vm3239_vm9, %v1590_v44, 0.0  ;;  %v1267_v34 = vrot.slane %v1266_v24, 4  ;;  %v1260_v0 = vsel %vm1244_vm2, %v1252_v10, 0.0  ;;  %v1254_v31 = vld [vmem:[%s3088_s0 + $0x20] sm:$0x7f]  ;;  %vm3247_vm9 = vmmov %vm3221_vm0 }
 0x216   :  { %v1594_v49 = vpop.eup %1593  ;;  %v801_v29 = vsel %vm3242_vm14, %v1592_v48, 0.0  ;;  %v1274_v55 = vrot.slane %v1273_v30, 4  ;;  %v1450_v62 = vcvt.f32.s32 %v1449_v58  ;;  %v1202_v8 = vrot.slane %v1201_v13, 2 }
 0x217   :  { %v800_v26 = vadd.f32 %v799_v38, %v798_v17  ;;  %v1596_v57 = vpop.eup %1595  ;;  %v803_v1 = vsel %vm3221_vm0, %v1594_v49, 0.0  ;;  %v2918_v7 = vadd.f32 %v1214_v23, %v1213_v18  ;;  %v1221_v39 = vrot.slane %v2887_v12, 4 }
 0x218   :  { %v1598_v32 = vpop.eup %1597  ;;  %v805_v6 = vsel %vm3244_vm1, %v1596_v57, 0.0  ;;  %v2921_v4 = vadd.f32 %v1181_v28, %v1180_v27  ;;  %vm1246_vm12 = vcmp.eq.s32.totalorder %v1706_v11, %v1469_v41  ;;  %vm1247_vm8 = vcmp.eq.s32.totalorder %v1706_v11, %v1470_v36  ;;  %v1606_v28 = vld [vmem:[%s3089_s1 + $0x1] sm:$0x1] }
 0x219   :  { %v802_v60 = vadd.f32 %v801_v29, %v800_v26  ;;  %v807_v18 = vsel %vm3245_vm15, %v1598_v32, 0.0  ;;  %v1261_v44 = vsel %vm1245_vm6, %v1253_v19, 0.0  ;;  %v1268_v27 = vadd.f32 %v1267_v34, %v1266_v24  ;;  %v1609_v32 = vld [vmem:[%s3089_s1 + $0x4] sm:$0x1] }
 0x21a   :  { %v1280_v33 = vsel %vm3246_vm5, %v1260_v0, 0.0  ;;  %vm726_vm3 = vcmp.ne.f32.partialorder %v1444_v42, 0.0  ;;  %v1275_v5 = vadd.f32 %v1274_v55, %v1273_v30  ;;  %v1445_v47 = vadd.s32 4294967295, %v1450_v62  ;;  %v1605_v30 = vld [vmem:[%s3089_s1] sm:$0x1] }
 0x21b   :  { %v804_v50 = vadd.f32 %v803_v1, %v802_v60  ;;  %v2941_v48 = vadd.f32 %v1188_v40, %v2866_v14  ;;  %v2944_v17 = vadd.f32 %v1195_v54, %v2868_v46  ;;  %v1209_v16 = vrot.slane %v2906_v9, 2  ;;  %v1472_v60 = vld [vmem:[%s3089_s1 + $0x7] ss:$0 sm:$0xff]  ;;  %v1607_v54 = vld [vmem:[%s3089_s1 + $0x2] sm:$0x1] }
 0x21c   :  { %v1262_v38 = vsel %vm1246_vm12, %v1254_v31, 0.0  ;;  %v1183_v2 = vrot.slane %v2921_v4, 1  ;;  %v2948_v51 = vadd.f32 %v1202_v8, %v1201_v13  ;;  %vm1248_vm11 = vcmp.eq.s32.totalorder %v1706_v11, %v2926_v3  ;;  %v1608_v1 = vld [vmem:[%s3089_s1 + $0x3] sm:$0x1]  ;;  %v1610_v0 = vld [vmem:[%s3089_s1 + $0x5] sm:$0x1] }
 0x21d   :  { %v806_v52 = vadd.f32 %v805_v6, %v804_v50  ;;  %v812_v49 = vsel %vm726_vm3, 1, %v3174_v20  ;;  %v1263_v14 = vsel %vm1247_vm8, %v1255_v45, 0.0  ;;  %v1281_v26 = vrot.slane %v1280_v33, 4  ;;  %v1611_v62 = vld [vmem:[%s3089_s1 + $0x6] sm:$0x1]  ;;  %vm3251_vm3 = vmmov %vm3246_vm5 }
 0x21e   :  { %v1287_v46 = vsel %vm3247_vm9, %v1261_v44, 0.0  ;;  %v1269_v23 = vrot.slane %v1268_v27, 2  ;;  %v1276_v24 = vrot.slane %v1275_v5, 2  ;;  %v1294_v29 = vsel %vm3248_vm10, %v1262_v38, 0.0  ;;  %v1612_v6 = vld [vmem:[%s3089_s1 + $0x7] sm:$0x1]  ;;  %vm3252_vm10 = vmmov %vm3251_vm3 }
 0x21f   :  { %v808_v22 = vadd.f32 %v807_v18, %v806_v52  ;;  %vm1371_vm7 = vcmp.eq.s32.totalorder %v1445_v47, 0  ;;  %vm1372_vm14 = vcmp.eq.s32.totalorder %v1445_v47, 1  ;;  %vm1373_vm2 = vcmp.eq.s32.totalorder %v1445_v47, 2  ;;  %v1256_v31 = vld [vmem:[%s3088_s0 + $0x30] sm:$0x7f] }
 0x220   :  { %vm1374_vm4 = vcmp.eq.s32.totalorder %v1445_v47, 3  ;;  %vm1375_vm0 = vcmp.eq.s32.totalorder %v1445_v47, 4  ;;  %v813_v13 = vperm.slane %v812_v49, 0  ;;  %vm1376_vm6 = vcmp.eq.s32.totalorder %v1445_v47, 5 }
 0x221   :  { %1599 = vlog2.f32 %v808_v22  ;;  %vm1377_vm1 = vcmp.eq.s32.totalorder %v1445_v47, 6  ;;  %vm1378_vm12 = vcmp.eq.s32.totalorder %v1445_v47, 7  ;;  %v1282_v20 = vadd.f32 %v1281_v26, %v1280_v33 }
 0x222   :  { %v1288_v41 = vrot.slane %v1287_v46, 4  ;;  %v1295_v10 = vrot.slane %v1294_v29, 4  ;;  %v1379_v58 = vsel %vm1371_vm7, %v1605_v30, 0  ;;  %v1380_v40 = vsel %vm1372_vm14, %v1606_v28, 0  ;;  %vm3253_vm7 = vmmov %vm3251_vm3 }
 0x223   :  { %v1381_v36 = vsel %vm1373_vm2, %v1607_v54, 0  ;;  %v1382_v34 = vsel %vm1374_vm4, %v1608_v1, 0  ;;  %v1383_v50 = vsel %vm1375_vm0, %v1609_v32, 0  ;;  %v1384_v55 = vsel %vm1376_vm6, %v1610_v0, 0  ;;  %vm3254_vm14 = vmmov %vm3251_vm3 }
 0x224   :  { %v1385_v42 = vsel %vm1377_vm1, %v1611_v62, 0  ;;  %v1386_v8 = vsel %vm1378_vm12, %v1612_v6, 0  ;;  %vm2991_vm8 = vcmp.eq.s32.totalorder %v813_v13, 1  ;;  %v1270_v18 = vadd.f32 %v1269_v23, %v1268_v27  ;;  %v3007_v27 = vpop.permute.xlu1 %818  ;;  %vm3257_vm6 = vmmov %vm3251_vm3 }
 0x225   :  { %v1277_v44 = vadd.f32 %v1276_v24, %v1275_v5  ;;  %v1387_v33 = vsel %vm1338_vm13, %v1379_v58, 0  ;;  %v1388_v45 = vsel %vm1338_vm13, %v1380_v40, 0  ;;  %v1389_v38 = vsel %vm1338_vm13, %v1381_v36, 0  ;;  %vm3258_vm12 = vmmov %vm3251_vm3 }
 0x226   :  { %v1390_v47 = vsel %vm1338_vm13, %v1382_v34, 0  ;;  %v1391_v49 = vsel %vm1338_vm13, %v1383_v50, 0  ;;  %v1393_v26 = vsel %vm1338_vm13, %v1384_v55, 0  ;;  %v1395_v13 = vsel %vm1338_vm13, %v1385_v42, 0  ;;  %v1257_v34 = vld [vmem:[%s3088_s0 + $0x38] sm:$0x7f] }
 0x227   :  { %v1600_v57 = vpop.eup %1599  ;;  %v1397_v30 = vsel %vm1338_vm13, %v1386_v8, 0  ;;  %v1190_v5 = vrot.slane %v2941_v48, 1  ;;  %vm1249_vm15 = vcmp.eq.s32.totalorder %v1706_v11, %v1472_v60  ;;  %v1264_v23 = vsel %vm1248_vm11, %v1256_v31, 0.0  ;;  %s1641_s0 = smov [#allocation2]  }
 0x228   :  { %v810_v19 = vmul.f32 0.6931472, %v1600_v57  ;;  %v1283_v58 = vrot.slane %v1282_v20, 2  ;;  %v1289_v57 = vadd.f32 %v1288_v41, %v1287_v46  ;;  %v1301_v28 = vsel %vm3246_vm5, %v1263_v14, 0.0  ;;  %s1420_s7 = sshll.u32 %s1641_s0, 4  ;;  %s1421_s7 = int_to_ptr.vmem [resolvable:$true] %s1420_s7 }
 0x229   :  { %v1392_v40 = vadd.s32 %v1391_v49, %v1387_v33  ;;  %v1394_v54 = vadd.s32 %v1393_v26, %v1388_v45  ;;  %v1396_v36 = vadd.s32 %v1395_v13, %v1389_v38  ;;  %v1398_v1 = vadd.s32 %v1397_v30, %v1390_v47 }
 0x22a   :  { %v811_v22 = vadd.f32 %v810_v19, %v2791_v15  ;;  %v1271_v3 = vrot.slane %v1270_v18, 1  ;;  %v1278_v32 = vrot.slane %v1277_v44, 1  ;;  %v1296_v50 = vadd.f32 %v1295_v10, %v1294_v29 }
 0x22b   :  { %vm866_vm11 = vcmp.ne.f32.partialorder %v2588_v53, 0.0  ;;  %vm867_vm9 = vcmp.ne.f32.partialorder %v2593_v43, 0.0  ;;  %v1216_v14 = vrot.slane %v2918_v7, 2  ;;  %v1222_v46 = vadd.f32 %v1221_v39, %v2887_v12 }
 0x22c   :  { %v815_v15 = vsel %vm2991_vm8, %v811_v22, %v2649_v21  ;;  %v1302_v41 = vrot.slane %v1301_v28, 4  ;;  %v1184_v0 = vadd.f32 %v1183_v2, %v2921_v4  ;;  %v1284_v55 = vadd.f32 %v1283_v58, %v1282_v20 }
 0x22d   :  { %v3018_v24 = vadd.f32 %v3007_v27, %v815_v15  ;;  %v1290_v62 = vrot.slane %v1289_v57, 2  ;;  %v1308_v29 = vsel %vm3252_vm10, %v1264_v23, 0.0  ;;  %v1265_v42 = vsel %vm1249_vm15, %v1257_v34, 0.0 }
 0x22e   :  { %v1399_v6 = vadd.s32 %v1394_v54, %v1392_v40  ;;  %v1400_v8 = vadd.s32 %v1398_v1, %v1396_v36  ;;  %v1191_v52 = vadd.f32 %v1190_v5, %v2941_v48  ;;  %v1272_v31 = vadd.f32 %v1271_v3, %v1270_v18 }
 0x22f   :  { %v822_v21 = vsel %vm3251_vm3, %v3018_v24, -inf  ;;  %v1279_v33 = vadd.f32 %v1278_v32, %v1277_v44  ;;  %v1297_v12 = vrot.slane %v1296_v50, 2  ;;  %v1227_v22 = vsel %vm3253_vm7, %v2881_v56, 0.0 }
 0x230   :  { %v823_v19 = vrot.slane %v822_v21, 4  ;;  %v1303_v4 = vadd.f32 %v1302_v41, %v1301_v28  ;;  %v1309_v2 = vrot.slane %v1308_v29, 4  ;;  %v1197_v20 = vrot.slane %v2944_v17, 1 }
 0x231   :  { %v1285_v45 = vrot.slane %v1284_v55, 1  ;;  %v1291_v38 = vadd.f32 %v1290_v62, %v1289_v57  ;;  %v1315_v60 = vsel %vm3254_vm14, %v1265_v42, 0.0  ;;  %vm868_vm2 = vcmp.ne.f32.partialorder %v2623_v35, 0.0 }
 0x232   :  { %v824_v10 = vmax.f32 %v822_v21, %v823_v19  ;;  %v1204_v48 = vrot.slane %v2948_v51, 1  ;;  %v1210_v18 = vadd.f32 %v1209_v16, %v2906_v9  ;;  %v1401_v44 = vadd.s32 %v1400_v8, %v1399_v6 }
 0x233   :  { %v1228_v49 = vrot.slane %v1227_v22, 4  ;;  %v1298_v56 = vadd.f32 %v1297_v12, %v1296_v50  ;;  %v1322_v26 = vadd.f32 %v1272_v31, %v1184_v0  ;;  %v1323_v13 = vadd.f32 %v1279_v33, %v1191_v52 }
 0x234   :  { %v825_v39 = vrot.slane %v824_v10, 2  ;;  %v1304_v15 = vrot.slane %v1303_v4, 2  ;;  %v1310_v5 = vadd.f32 %v1309_v2, %v1308_v29  ;;  %v1316_v23 = vrot.slane %v1315_v60, 4 }
 0x235   :  { %v1198_v58 = vadd.f32 %v1197_v20, %v2944_v17  ;;  %v1217_v57 = vadd.f32 %v1216_v14, %v2918_v7  ;;  %v1286_v28 = vadd.f32 %v1285_v45, %v1284_v55  ;;  %v1292_v40 = vrot.slane %v1291_v38, 1 }
 0x236   :  { %v826_v47 = vmax.f32 %v824_v10, %v825_v39  ;;  %v1211_v36 = vrot.slane %v1210_v18, 1  ;;  %v1223_v1 = vrot.slane %v1222_v46, 2  ;;  %v1402_v9 = vperm.slane %v1401_v44, 0 }
 0x237   :  { %v1229_v16 = vadd.f32 %v1228_v49, %v1227_v22  ;;  %v1299_v21 = vrot.slane %v1298_v56, 1  ;;  %v1330_v34 = vsel %vm866_vm11, %v1322_v26, 0.0  ;;  %v1331_v3 = vsel %vm867_vm9, %v1323_v13, 0.0 }
 0x238   :  { %v827_v30 = vrot.slane %v826_v47, 1  ;;  %v1305_v32 = vadd.f32 %v1304_v15, %v1303_v4  ;;  %v1311_v7 = vrot.slane %v1310_v5, 2  ;;  %v1317_v50 = vadd.f32 %v1316_v23, %v1315_v60 }
 0x239   :  { %v1205_v19 = vadd.f32 %v1204_v48, %v2948_v51  ;;  %v1218_v14 = vrot.slane %v1217_v57, 1  ;;  %v1293_v41 = vadd.f32 %v1292_v40, %v1291_v38  ;;  %v1324_v0 = vadd.f32 %v1286_v28, %v1198_v58 }
 0x23a   :  { %v3050_v54 = vmax.f32 %v826_v47, %v827_v30  ;;  %v1339_v62 = vsel %vm1338_vm13, %v1330_v34, 0.0  ;;  %v1340_v53 = vsel %vm1338_vm13, %v1331_v3, 0.0  ;;  %vm3062_vm4 = vcmp.eq.s32.totalorder %v1706_v11, %v1402_v9 }
 0x23b   :  { %v1212_v29 = vadd.f32 %v1211_v36, %v1210_v18  ;;  %v1230_v10 = vrot.slane %v1229_v16, 2  ;;  %v1300_v42 = vadd.f32 %v1299_v21, %v1298_v56  ;;  %v1306_v6 = vrot.slane %v1305_v32, 1 }
 0x23c   :  { %v829_v17 = vsub.f32 %v3018_v24, %v3050_v54  ;;  %v1224_v24 = vadd.f32 %v1223_v1, %v1222_v46  ;;  %v1312_v51 = vadd.f32 %v1311_v7, %v1310_v5  ;;  %v1318_v8 = vrot.slane %v1317_v50, 2 }
 0x23d   :  { %v1325_v52 = vadd.f32 %v1293_v41, %v1205_v19  ;;  %v1332_v31 = vsel %vm868_vm2, %v1324_v0, 0.0  ;;  %v1341_v33 = vadd.f32 %v1340_v53, %v1339_v62  ;;  %v1404_v11 = vsel %vm3062_vm4, %v3007_v27, 0.0 }
 0x23e   :  { %v830_v55 = vmul.f32 1.442695, %v829_v17  ;;  %vm869_vm0 = vcmp.ne.f32.partialorder %v2643_v63, 0.0  ;;  %v1219_v12 = vadd.f32 %v1218_v14, %v1217_v57  ;;  %v1225_v39 = vrot.slane %v1224_v24, 1 }
 0x23f   :  { %v1231_v46 = vadd.f32 %v1230_v10, %v1229_v16  ;;  %v1307_v22 = vadd.f32 %v1306_v6, %v1305_v32  ;;  %v1313_v4 = vrot.slane %v1312_v51, 1  ;;  %v1342_v2 = vsel %vm1338_vm13, %v1332_v31, 0.0 }
 0x240   :  { %1601 = vpow2.f32 %v830_v55  ;;  %v1405_v20 = vsel %vm3257_vm6, %v1404_v11, 0.0  ;;  %v1319_v45 = vadd.f32 %v1318_v8, %v1317_v50  ;;  %v1326_v38 = vadd.f32 %v1300_v42, %v1212_v29 }
 0x241   :  { %v1333_v35 = vsel %vm869_vm0, %v1325_v52, 0.0  ;;  %v1343_v60 = vadd.f32 %v1342_v2, %v1341_v33  ;;  %vm870_vm1 = vcmp.ne.f32.partialorder %v2692_v61, 0.0  ;;  %v1226_v48 = vadd.f32 %v1225_v39, %v1224_v24 }
 0x242   :  { %v1406_v63 = vrot.slane %v1405_v20, 4  ;;  %v1232_v44 = vrot.slane %v1231_v46, 1  ;;  %v1314_v49 = vadd.f32 %v1313_v4, %v1312_v51  ;;  %v1344_v56 = vsel %vm1338_vm13, %v1333_v35, 0.0 }
 0x243   :  { %v1320_v26 = vrot.slane %v1319_v45, 1  ;;  %v1327_v13 = vadd.f32 %v1307_v22, %v1219_v12  ;;  %v1334_v30 = vsel %vm870_vm1, %v1326_v38, 0.0  ;;  %v1345_v15 = vadd.f32 %v1344_v56, %v1343_v60 }
 0x244   :  { %vm871_vm8 = vcmp.ne.f32.partialorder %v2724_v25, 0.0  ;;  %v1407_v23 = vadd.f32 %v1406_v63, %v1405_v20  ;;  %v1233_v57 = vadd.f32 %v1232_v44, %v1231_v46  ;;  %v1346_v61 = vsel %vm1338_vm13, %v1334_v30, 0.0 }
 0x245   :  { %v1321_v28 = vadd.f32 %v1320_v26, %v1319_v45  ;;  %v1328_v40 = vadd.f32 %v1314_v49, %v1226_v48  ;;  %v1335_v36 = vsel %vm871_vm8, %v1327_v13, 0.0  ;;  %v1347_v1 = vadd.f32 %v1346_v61, %v1345_v15 }
 0x246   :  { %v1602_v47 = vpop.eup %1601  ;;  %vm872_vm15 = vcmp.ne.f32.partialorder %v2796_v37, 0.0  ;;  %v1408_v16 = vrot.slane %v1407_v23, 2  ;;  %v1348_v34 = vsel %vm1338_vm13, %v1335_v36, 0.0  ;;  %vm873_vm5 = vcmp.ne.f32.partialorder %v2820_v59, 0.0 }
 0x247   :  { %v832_v27 = vsel %vm3258_vm12, %v1602_v47, 0.0  ;;  %v1329_v3 = vadd.f32 %v1321_v28, %v1233_v57  ;;  %v1336_v17 = vsel %vm872_vm15, %v1328_v40, 0.0  ;;  %v1349_v32 = vadd.f32 %v1348_v34, %v1347_v1 }
 0x248   :  { %v833_v18 = vrot.slane %v832_v27, 4  ;;  %v1409_v7 = vadd.f32 %v1408_v16, %v1407_v23  ;;  %v1350_v50 = vsel %vm1338_vm13, %v1336_v17, 0.0 }
 0x249   :  { %v1337_v19 = vsel %vm873_vm5, %v1329_v3, 0.0  ;;  %v1351_v14 = vadd.f32 %v1350_v50, %v1349_v32 }
 0x24a   :  { %v834_v5 = vadd.f32 %v833_v18, %v832_v27  ;;  %v1410_v41 = vrot.slane %v1409_v7, 1  ;;  %v1352_v0 = vsel %vm1338_vm13, %v1337_v19, 0.0 }
 0x24b   :  { %v1353_v37 = vadd.f32 %v1352_v0, %v1351_v14 }
 0x24c   :  { %v835_v58 = vrot.slane %v834_v5, 2  ;;  %v1411_v53 = vadd.f32 %v1410_v41, %v1409_v7 }
 0x24e   :  { %v836_v9 = vadd.f32 %v835_v58, %v834_v5  ;;  %v1412_v43 = vadd.f32 %v1411_v53, %v1353_v37 }
 0x250   :  { %v837_v21 = vrot.slane %v836_v9, 1 }
 0x252   :  { %v838_v25 = vadd.f32 %v837_v21, %v836_v9 }
 0x254   :  { %1603 = vlog2.f32 %v838_v25 }
 0x25a   :  { %v1604_v55 = vpop.eup %1603 }
 0x25b   :  { %v840_v62 = vmul.f32 0.6931472, %v1604_v55 }
 0x25d   :  { %v841_v59 = vadd.f32 %v840_v62, %v3050_v54 }
 0x25f   :  { %v1413_v29 = vsub.f32 %v841_v59, %v1412_v43 }
 0x261   :  { %1414 = vst [vmem:[#allocation2] sm:$0x1] %v1413_v29 }
 0x262   :  { %1425 = dma.vmem_to_hbm [thread:$0]  %s1421_s7, 16, %s1423_s3, [#allocation3]  }
 0x263   :  { %1637 = dma.done.wait [#allocation3], 16  }
 0x264   :  { %1638 = vsyncadd [#allocation3], 4294967280 }
 0x265   :  { %1430 = vsyncpa [#allocation3], 1 }

</bundles_post_ra>
